<compile_context>
chip_gen: v7x
topology: tpu7x:2x2x1
jax: 0.10.0
libtpu: 0.0.40
codegen_flags: <defaults>
</compile_context>

<pallas_src>
import functools
import math

import numpy as np
import jax
import jax.numpy as jnp
from jax.experimental import pallas as pl
from jax.experimental.pallas import tpu as pltpu


# ----------------------------------------------------------------------------
# Host-side helpers (parameter setup; non-differentiable preprocessing that the
# PyTorch module also does on the host / with detached tensors).
# ----------------------------------------------------------------------------
def _pchip_edge_slope(h0, h1, d0, d1):
    d = ((2.0 * h0 + h1) * d0 - h0 * d1) / (h0 + h1)
    if np.sign(d) != np.sign(d0):
        d = 0.0
    elif (np.sign(d0) != np.sign(d1)) and (abs(d) > 3.0 * abs(d0)):
        d = 3.0 * d0
    return d


def pchip_interpolate(xi, yi, x):
    """NumPy reimplementation of scipy.interpolate.pchip_interpolate."""
    xi = np.asarray(xi, dtype=np.float64)
    yi = np.asarray(yi, dtype=np.float64)
    x = np.asarray(x, dtype=np.float64)
    n = xi.shape[0]
    h = np.diff(xi)
    delta = np.diff(yi) / h
    d = np.zeros(n, dtype=np.float64)
    for k in range(1, n - 1):
        if delta[k - 1] * delta[k] <= 0.0:
            d[k] = 0.0
        else:
            w1 = 2.0 * h[k] + h[k - 1]
            w2 = h[k] + 2.0 * h[k - 1]
            d[k] = (w1 + w2) / (w1 / delta[k - 1] + w2 / delta[k])
    d[0] = _pchip_edge_slope(h[0], h[1], delta[0], delta[1])
    d[-1] = _pchip_edge_slope(h[-1], h[-2], delta[-1], delta[-2])

    idx = np.clip(np.searchsorted(xi, x, side="left") - 1, 0, n - 2)
    t = (x - xi[idx]) / h[idx]
    t2 = t * t
    t3 = t2 * t
    h00 = 2.0 * t3 - 3.0 * t2 + 1.0
    h10 = t3 - 2.0 * t2 + t
    h01 = -2.0 * t3 + 3.0 * t2
    h11 = t3 - t2
    return (h00 * yi[idx] + h10 * h[idx] * d[idx]
            + h01 * yi[idx + 1] + h11 * h[idx] * d[idx + 1])


def build_patlak_mult(sample_time, Cp):
    """Mirror DCE._param_to_conc_patlak host preprocessing.

    Returns mult_sel of shape (T, 2): rows [K_time(t), AIF(t)] at the sample
    times (row-selection commutes with the subsequent matmul)."""
    st = np.squeeze(np.asarray(sample_time, dtype=np.float64))
    cp = np.asarray(Cp, dtype=np.float64).T.reshape(-1)      # transpose(0,1).view(-1)
    t_end = float(st[-1])
    step = 0.1
    t_samp = np.arange(0.0, t_end + step, step)
    t_nonzero = t_samp[t_samp != 0.0]
    dt_last = np.diff(t_nonzero)[-1]
    aifci = pchip_interpolate(st, cp, t_samp)
    k_time = np.cumsum(aifci) * dt_last
    mult = np.stack([k_time, aifci], axis=1)                  # (n_samp, 2)
    log_idx = np.zeros(t_samp.shape[0], dtype=bool)
    for tt in st:
        log_idx[int(np.argmin(np.abs(t_samp - tt)))] = True
    return mult[log_idx].astype(np.float32)                   # (T, 2)


def shifted_dft_matrix(n):
    """Matrix M such that M @ v == fftshift(fft(fftshift(v), norm='ortho'))."""
    eye = np.eye(n, dtype=np.complex128)
    m = np.fft.fftshift(
        np.fft.fft(np.fft.fftshift(eye, axes=0), axis=0, norm="ortho"), axes=0)
    return m.astype(np.complex64)


# ----------------------------------------------------------------------------
# bf16 hi/lo splitting (~f32-accurate matmuls on the native bf16 MXU).
# ----------------------------------------------------------------------------
def _split_f32(x):
    """Split an f32 array into bf16 hi + bf16 lo (x ~= hi + lo)."""
    hi = x.astype(jnp.bfloat16)
    lo = (x - hi.astype(jnp.float32)).astype(jnp.bfloat16)
    return hi, lo


def _host_split_complex(m):
    """Pre-split a complex constant matrix into 6 bf16 planes (done ONCE on the
    host, not every grid step): [re_hi, re_lo, im_hi, im_lo, (re+im)_hi,
    (re+im)_lo].  The (re+im) plane feeds the Gauss 3-mult identity."""
    m = np.asarray(m, dtype=np.complex64)
    planes = []
    for p in (np.real(m), np.imag(m), np.real(m) + np.imag(m)):
        p32 = jnp.asarray(p, dtype=jnp.float32)
        hi, lo = _split_f32(p32)
        planes.extend([hi, lo])
    return jnp.stack(planes)          # (6, n, n) bf16


def _dot(a, b):
    return jnp.dot(a, b, preferred_element_type=jnp.float32)


def _mm_cl(c_hi, c_lo, d):
    """const(left) @ data via 3 native bf16 MXU passes (~f32 accuracy)."""
    d_hi, d_lo = _split_f32(d)
    return _dot(c_hi, d_hi) + _dot(c_hi, d_lo) + _dot(c_lo, d_hi)


def _mm_cr(d, c_hi, c_lo):
    """data @ const(right) via 3 native bf16 MXU passes (~f32 accuracy)."""
    d_hi, d_lo = _split_f32(d)
    return _dot(d_hi, c_hi) + _dot(d_lo, c_hi) + _dot(d_hi, c_lo)


def _cmm_const_left(cm, dr, di):
    """(complex const) @ (complex data), Gauss 3-mult. cm = 6 bf16 planes."""
    t1 = _mm_cl(cm[0], cm[1], dr)
    t2 = _mm_cl(cm[2], cm[3], di)
    t3 = _mm_cl(cm[4], cm[5], dr + di)
    return t1 - t2, t3 - t1 - t2


def _cmm_const_right(dr, di, cm):
    """(complex data) @ (complex const), Gauss 3-mult. cm = 6 bf16 planes."""
    t1 = _mm_cr(dr, cm[0], cm[1])
    t2 = _mm_cr(di, cm[2], cm[3])
    t3 = _mm_cr(dr + di, cm[4], cm[5])
    return t1 - t2, t3 - t1 - t2


# ----------------------------------------------------------------------------
# Pallas kernel: grid = (coil_groups, T), T innermost.  One (group, time) step
# computes the transcendental signal model once and then, per coil in the
# group, the complex csm multiply + shifted 2-D DFT (two complex matmuls),
# writing straight into the (T, C, H, W) output block.
# ----------------------------------------------------------------------------
def _dce_kernel(mult_ref, xr_ref, xi_ref, r1_ref, m0t_ref, off_ref,
                csmr_ref, csmi_ref, a_ref, b_ref,
                outr_ref, outi_ref, *, tr, r1ca, cos_fa, coils_per_group):
    t = pl.program_id(1)
    k_time = mult_ref[t, 0]          # cumulative AIF integral at time t
    aif = mult_ref[t, 1]             # AIF at time t

    # Patlak "matmul": conc = mult[t, :] @ x_params (contraction over 2 params)
    ca_r = k_time * xr_ref[0] + aif * xr_ref[1]
    ca_i = k_time * xi_ref[0] + aif * xi_ref[1]

    # --- signal model, computed ONCE per step (shared by all coils) ---------
    # E1CA = exp(-TR * (R1 + R1CA * CA))   (complex exponential)
    re = -tr * (r1_ref[...] + r1ca * ca_r)
    im = -tr * (r1ca * ca_i)
    mag = jnp.exp(re)
    e1_r = mag * jnp.cos(im)
    e1_i = mag * jnp.sin(im)

    # CA_trans = M0_trans * (1 - E1CA) / (1 - E1CA * cos(FA))   (complex div)
    num_r = m0t_ref[...] * (1.0 - e1_r)
    num_i = m0t_ref[...] * (-e1_i)
    den_r = 1.0 - e1_r * cos_fa
    den_i = -e1_i * cos_fa
    # EUP reciprocal (off the VALU critical path); within the error budget.
    inv_den2 = pl.reciprocal(den_r * den_r + den_i * den_i, approx=True)
    # sig = CA_trans + (sig_baseline - M_steady)
    sig_r = (num_r * den_r + num_i * den_i) * inv_den2 + off_ref[...]
    sig_i = (num_i * den_r - num_r * den_i) * inv_den2

    # Grid-invariant, host-pre-split bf16 DFT matrices (loaded once per step).
    a_planes = tuple(a_ref[k] for k in range(6))   # row transform  (H, H)
    b_planes = tuple(b_ref[k] for k in range(6))   # col transform  (W, W)

    # --- per coil: csm multiply (broadcasts sig on the VPU — no rep matmul) -
    # and shifted 2-D DFT as two complex matmuls:  A @ (sig*csm_c) @ B.
    for c in range(coils_per_group):
        cr = csmr_ref[c]
        ci = csmi_ref[c]
        sm_r = sig_r * cr - sig_i * ci
        sm_i = sig_r * ci + sig_i * cr
        z_r, z_i = _cmm_const_left(a_planes, sm_r, sm_i)     # rows
        y_r, y_i = _cmm_const_right(z_r, z_i, b_planes)      # columns
        outr_ref[0, c] = y_r
        outi_ref[0, c] = y_i


def dce_forward_pallas(x, mult_sel, r1, m0_trans, offset, csm, A, B,
                       *, tr, r1ca, cos_fa, coil_group=None):
    """x: (2, 1, H, W, 2) float32 (real/imag interleaved). A, B: numpy complex
    shifted-DFT matrices (A acts on rows from the left, B on columns from the
    right). Returns (ksp_real, ksp_imag) float32 planes of shape (T, C, H, W);
    the complex64 pack is deferred to the consumer."""
    P, _, H, W, _ = x.shape
    T = mult_sel.shape[0]
    C = csm.shape[0]
    if coil_group is None:
        coil_group = C
    assert C % coil_group == 0, "coil_group must divide the number of coils"
    n_groups = C // coil_group

    x_r = x[..., 0].reshape(P, H, W)
    x_i = x[..., 1].reshape(P, H, W)

    csm_r = jnp.real(csm).astype(jnp.float32)        # (C, H, W)
    csm_i = jnp.imag(csm).astype(jnp.float32)

    a_stack = _host_split_complex(A)                  # (6, H, H) bf16
    b_stack = _host_split_complex(B)                  # (6, W, W) bf16

    kernel = functools.partial(_dce_kernel, tr=tr, r1ca=r1ca, cos_fa=cos_fa,
                               coils_per_group=coil_group)

    # Explicit VMEM budget: invariant operands, pipelined csm/output blocks and
    # working-set headroom; clamped so it also fits v7x (64 MiB / TensorCore).
    f32b = 4
    resident = (2 * P * H * W * f32b                      # x real/imag planes
                + 3 * H * W * f32b                        # R1 / M0_trans / offset
                + 2 * (a_stack.size + b_stack.size)       # bf16 DFT constants
                + 2 * 2 * coil_group * H * W * f32b       # csm group (2 buffers)
                + 2 * 2 * coil_group * H * W * f32b       # out block (2 buffers)
                + 24 * H * W * f32b)                      # matmul/VPU temporaries
    vmem_limit = int(min(56 * 2 ** 20, max(32 * 2 ** 20, 2 * resident)))

    out_r, out_i = pl.pallas_call(
        kernel,
        out_shape=(jax.ShapeDtypeStruct((T, C, H, W), jnp.float32),
                   jax.ShapeDtypeStruct((T, C, H, W), jnp.float32)),
        grid=(n_groups, T),                 # T innermost: csm group loaded once
        in_specs=[
            pl.BlockSpec(memory_space=pltpu.MemorySpace.SMEM),       # mult (T, 2)
            pl.BlockSpec((P, H, W), lambda g, t: (0, 0, 0)),         # x real
            pl.BlockSpec((P, H, W), lambda g, t: (0, 0, 0)),         # x imag
            pl.BlockSpec((H, W), lambda g, t: (0, 0)),               # R1 map
            pl.BlockSpec((H, W), lambda g, t: (0, 0)),               # M0_trans map
            pl.BlockSpec((H, W), lambda g, t: (0, 0)),               # sig_baseline - M_steady
            pl.BlockSpec((coil_group, H, W), lambda g, t: (g, 0, 0)),  # csm real
            pl.BlockSpec((coil_group, H, W), lambda g, t: (g, 0, 0)),  # csm imag
            pl.BlockSpec((6, H, H), lambda g, t: (0, 0, 0)),         # A bf16 planes
            pl.BlockSpec((6, W, W), lambda g, t: (0, 0, 0)),         # B bf16 planes
        ],
        out_specs=(pl.BlockSpec((1, coil_group, H, W), lambda g, t: (t, g, 0, 0)),
                   pl.BlockSpec((1, coil_group, H, W), lambda g, t: (t, g, 0, 0))),
        compiler_params=pltpu.CompilerParams(
            dimension_semantics=("parallel", "parallel"),
            vmem_limit_bytes=vmem_limit),
    )(mult_sel, x_r, x_i, r1, m0_trans, offset, csm_r, csm_i, a_stack, b_stack)

    return out_r, out_i


# ----------------------------------------------------------------------------
# Pure-JAX reference (same math as the PyTorch forward) for a sanity check.
# ----------------------------------------------------------------------------
def dce_forward_reference(x, mult_sel, r1, m0_trans, offset, csm,
                          *, tr, r1ca, cos_fa):
    x_c = (x[..., 0] + 1j * x[..., 1]).astype(jnp.complex64)    # (2, 1, H, W)
    P = x_c.shape[0]
    xr = x_c.reshape(P, -1)
    conc = jnp.matmul(mult_sel.astype(jnp.complex64), xr)       # (T, H*W)
    CA = conc.reshape((mult_sel.shape[0],) + x_c.shape[1:])     # (T, 1, H, W)
    E1CA = jnp.exp(-tr * (r1 + r1ca * CA))
    CA_trans = m0_trans * (1.0 - E1CA) / (1.0 - E1CA * cos_fa)
    sig = CA_trans + offset
    sig_maps = sig * csm                                        # (T, C, H, W)
    y = jnp.fft.fftshift(sig_maps, axes=(-2, -1))
    y = jnp.fft.fft2(y, axes=(-2, -1), norm="ortho")
    y = jnp.fft.fftshift(y, axes=(-2, -1))
    return y


if __name__ == "__main__":
    H = W = 16
    C = 4
    n_times = 8
    TR = 0.00487
    R1CA = 4.3
    FA = 10.0
    fa_rad = FA * math.pi / 180.0
    cos_fa = math.cos(fa_rad)
    sin_fa = math.sin(fa_rad)

    key = jax.random.PRNGKey(0)
    k_x, k_csm_r, k_csm_i, k_base, k_r1 = jax.random.split(key, 5)

    # Synthetic acquisition metadata (stands in for t.mat / AIF measurements).
    sample_time = (np.arange(n_times, dtype=np.float64) * 0.5).reshape(1, n_times)
    t_host = np.squeeze(sample_time)
    Cp = (4.0 * t_host * np.exp(-t_host / 1.2)).reshape(1, n_times)

    # Parameter image x: (Ktrans, vp) maps, complex packed as trailing dim 2.
    x = 0.05 * jax.random.normal(k_x, (2, 1, H, W, 2), dtype=jnp.float32)

    csm = ((jax.random.normal(k_csm_r, (C, H, W), dtype=jnp.float32)
            + 1j * jax.random.normal(k_csm_i, (C, H, W), dtype=jnp.float32))
           / math.sqrt(C)).astype(jnp.complex64)

    sig_baseline = 5.0 + jax.random.uniform(k_base, (H, W), dtype=jnp.float32)
    R1 = 1.0 + 0.2 * jax.random.uniform(k_r1, (H, W), dtype=jnp.float32)

    # __init__-derived maps (glue / parameter setup, plain JAX).
    E1 = jnp.exp(-TR * R1)
    M0 = sig_baseline * (1.0 - cos_fa * E1) / (sin_fa * (1.0 - E1))
    M0_trans = M0 * sin_fa
    M_steady = M0_trans * (1.0 - E1) / (1.0 - E1 * cos_fa)
    offset = sig_baseline - M_steady

    mult_sel = jnp.asarray(build_patlak_mult(sample_time, Cp))   # (T, 2)
    A = shifted_dft_matrix(H)          # acts on rows (axis -2), numpy complex64
    B = shifted_dft_matrix(W).T        # acts on cols (axis -1) from the right

    # coil_group=2 exercises the multi-group (VMEM-tiling) path of the grid.
    ksp_r, ksp_i = dce_forward_pallas(x, mult_sel, R1, M0_trans, offset, csm,
                                      A, B, tr=TR, r1ca=R1CA, cos_fa=cos_fa,
                                      coil_group=2)
    ksp_r = jax.block_until_ready(ksp_r)
    ksp_i = jax.block_until_ready(ksp_i)
    ksp = np.asarray(ksp_r) + 1j * np.asarray(ksp_i)

    ref = dce_forward_reference(x, mult_sel, R1, M0_trans, offset, csm,
                                tr=TR, r1ca=R1CA, cos_fa=cos_fa)
    ref = jax.block_until_ready(ref)
    np.testing.assert_allclose(ksp, np.asarray(ref), rtol=2e-2, atol=2e-2)

    print("KERNEL_OK")
</pallas_src>

<mosaic_0001>
module attributes {stable_mosaic.version = 11 : i64} {
  func.func @_dce_kernel(%arg0: i32, %arg1: i32, %arg2: memref<8x2xf32, #tpu.memory_space<smem>>, %arg3: memref<2x16x16xf32, #tpu.memory_space<vmem>>, %arg4: memref<2x16x16xf32, #tpu.memory_space<vmem>>, %arg5: memref<16x16xf32, #tpu.memory_space<vmem>>, %arg6: memref<16x16xf32, #tpu.memory_space<vmem>>, %arg7: memref<16x16xf32, #tpu.memory_space<vmem>>, %arg8: memref<2x16x16xf32, #tpu.memory_space<vmem>>, %arg9: memref<2x16x16xf32, #tpu.memory_space<vmem>>, %arg10: memref<6x16x16xbf16, #tpu.memory_space<vmem>>, %arg11: memref<6x16x16xbf16, #tpu.memory_space<vmem>>, %arg12: memref<1x2x16x16xf32, #tpu.memory_space<vmem>>, %arg13: memref<1x2x16x16xf32, #tpu.memory_space<vmem>>) attributes {dimension_semantics = [#tpu.dimension_semantics<parallel>, #tpu.dimension_semantics<parallel>], iteration_bounds = array<i64: 2, 8>, scalar_prefetch = 0 : i64, scratch_operands = 0 : i64, tpu.core_type = #tpu.core_type<tc>, window_params = [{transform_indices = @transform_0, window_bounds = array<i64: 8, 2>}, {pipeline_mode = #tpu.pipeline_mode<synchronous>, transform_indices = @transform_1, window_bounds = array<i64: 2, 16, 16>}, {pipeline_mode = #tpu.pipeline_mode<synchronous>, transform_indices = @transform_2, window_bounds = array<i64: 2, 16, 16>}, {pipeline_mode = #tpu.pipeline_mode<synchronous>, transform_indices = @transform_3, window_bounds = array<i64: 16, 16>}, {pipeline_mode = #tpu.pipeline_mode<synchronous>, transform_indices = @transform_4, window_bounds = array<i64: 16, 16>}, {pipeline_mode = #tpu.pipeline_mode<synchronous>, transform_indices = @transform_5, window_bounds = array<i64: 16, 16>}, {transform_indices = @transform_6, window_bounds = array<i64: 2, 16, 16>}, {transform_indices = @transform_7, window_bounds = array<i64: 2, 16, 16>}, {pipeline_mode = #tpu.pipeline_mode<synchronous>, transform_indices = @transform_8, window_bounds = array<i64: 6, 16, 16>}, {pipeline_mode = #tpu.pipeline_mode<synchronous>, transform_indices = @transform_9, window_bounds = array<i64: 6, 16, 16>}, {transform_indices = @transform_10, window_bounds = array<i64: 1, 2, 16, 16>}, {transform_indices = @transform_11, window_bounds = array<i64: 1, 2, 16, 16>}]} {
    %0 = arith.index_cast %arg1 : i32 to index
    %c0 = arith.constant 0 : index
    %1 = memref.load %arg2[%0, %c0] : memref<8x2xf32, #tpu.memory_space<smem>>
    %2 = arith.index_cast %arg1 : i32 to index
    %c1 = arith.constant 1 : index
    %3 = memref.load %arg2[%2, %c1] : memref<8x2xf32, #tpu.memory_space<smem>>
    %c0_0 = arith.constant 0 : index
    %c0_1 = arith.constant 0 : index
    %c0_2 = arith.constant 0 : index
    %4 = vector.load %arg3[%c0_0, %c0_1, %c0_2] : memref<2x16x16xf32, #tpu.memory_space<vmem>>, vector<1x16x16xf32>
    %5 = vector.shape_cast %4 : vector<1x16x16xf32> to vector<16x16xf32>
    %6 = vector.broadcast %1 : f32 to vector<16x16xf32>
    %7 = arith.mulf %6, %5 : vector<16x16xf32>
    %c1_3 = arith.constant 1 : index
    %c0_4 = arith.constant 0 : index
    %c0_5 = arith.constant 0 : index
    %8 = vector.load %arg3[%c1_3, %c0_4, %c0_5] : memref<2x16x16xf32, #tpu.memory_space<vmem>>, vector<1x16x16xf32>
    %9 = vector.shape_cast %8 : vector<1x16x16xf32> to vector<16x16xf32>
    %10 = vector.broadcast %3 : f32 to vector<16x16xf32>
    %11 = arith.mulf %10, %9 : vector<16x16xf32>
    %12 = arith.addf %7, %11 : vector<16x16xf32>
    %c0_6 = arith.constant 0 : index
    %c0_7 = arith.constant 0 : index
    %c0_8 = arith.constant 0 : index
    %13 = vector.load %arg4[%c0_6, %c0_7, %c0_8] : memref<2x16x16xf32, #tpu.memory_space<vmem>>, vector<1x16x16xf32>
    %14 = vector.shape_cast %13 : vector<1x16x16xf32> to vector<16x16xf32>
    %15 = vector.broadcast %1 : f32 to vector<16x16xf32>
    %16 = arith.mulf %15, %14 : vector<16x16xf32>
    %c1_9 = arith.constant 1 : index
    %c0_10 = arith.constant 0 : index
    %c0_11 = arith.constant 0 : index
    %17 = vector.load %arg4[%c1_9, %c0_10, %c0_11] : memref<2x16x16xf32, #tpu.memory_space<vmem>>, vector<1x16x16xf32>
    %18 = vector.shape_cast %17 : vector<1x16x16xf32> to vector<16x16xf32>
    %19 = vector.broadcast %3 : f32 to vector<16x16xf32>
    %20 = arith.mulf %19, %18 : vector<16x16xf32>
    %21 = arith.addf %16, %20 : vector<16x16xf32>
    %c0_12 = arith.constant 0 : index
    %c0_13 = arith.constant 0 : index
    %22 = vector.load %arg5[%c0_12, %c0_13] : memref<16x16xf32, #tpu.memory_space<vmem>>, vector<16x16xf32>
    %cst = arith.constant 4.300000e+00 : f32
    %23 = vector.broadcast %cst : f32 to vector<16x16xf32>
    %24 = arith.mulf %23, %12 : vector<16x16xf32>
    %25 = arith.addf %22, %24 : vector<16x16xf32>
    %cst_14 = arith.constant -4.870000e-03 : f32
    %26 = vector.broadcast %cst_14 : f32 to vector<16x16xf32>
    %27 = arith.mulf %26, %25 : vector<16x16xf32>
    %cst_15 = arith.constant 4.300000e+00 : f32
    %28 = vector.broadcast %cst_15 : f32 to vector<16x16xf32>
    %29 = arith.mulf %28, %21 : vector<16x16xf32>
    %cst_16 = arith.constant -4.870000e-03 : f32
    %30 = vector.broadcast %cst_16 : f32 to vector<16x16xf32>
    %31 = arith.mulf %30, %29 : vector<16x16xf32>
    %32 = math.exp %27 : vector<16x16xf32>
    %33 = math.cos %31 : vector<16x16xf32>
    %34 = arith.mulf %32, %33 : vector<16x16xf32>
    %35 = math.sin %31 : vector<16x16xf32>
    %36 = arith.mulf %32, %35 : vector<16x16xf32>
    %c0_17 = arith.constant 0 : index
    %c0_18 = arith.constant 0 : index
    %37 = vector.load %arg6[%c0_17, %c0_18] : memref<16x16xf32, #tpu.memory_space<vmem>>, vector<16x16xf32>
    %cst_19 = arith.constant 1.000000e+00 : f32
    %38 = vector.broadcast %cst_19 : f32 to vector<16x16xf32>
    %39 = arith.subf %38, %34 : vector<16x16xf32>
    %40 = arith.mulf %37, %39 : vector<16x16xf32>
    %c0_20 = arith.constant 0 : index
    %c0_21 = arith.constant 0 : index
    %41 = vector.load %arg6[%c0_20, %c0_21] : memref<16x16xf32, #tpu.memory_space<vmem>>, vector<16x16xf32>
    %cst_22 = arith.constant 0.000000e+00 : f32
    %42 = vector.broadcast %cst_22 : f32 to vector<16x16xf32>
    %43 = arith.subf %42, %36 : vector<16x16xf32>
    %44 = arith.mulf %41, %43 : vector<16x16xf32>
    %cst_23 = arith.constant 0.984807729 : f32
    %45 = vector.broadcast %cst_23 : f32 to vector<16x16xf32>
    %46 = arith.mulf %34, %45 : vector<16x16xf32>
    %cst_24 = arith.constant 1.000000e+00 : f32
    %47 = vector.broadcast %cst_24 : f32 to vector<16x16xf32>
    %48 = arith.subf %47, %46 : vector<16x16xf32>
    %cst_25 = arith.constant 0.000000e+00 : f32
    %49 = vector.broadcast %cst_25 : f32 to vector<16x16xf32>
    %50 = arith.subf %49, %36 : vector<16x16xf32>
    %cst_26 = arith.constant 0.984807729 : f32
    %51 = vector.broadcast %cst_26 : f32 to vector<16x16xf32>
    %52 = arith.mulf %50, %51 : vector<16x16xf32>
    %53 = arith.mulf %48, %48 : vector<16x16xf32>
    %54 = arith.mulf %52, %52 : vector<16x16xf32>
    %55 = arith.addf %53, %54 : vector<16x16xf32>
    %56 = tpu.reciprocal %55 {approx = true} : vector<16x16xf32> -> vector<16x16xf32>
    %57 = arith.mulf %40, %48 : vector<16x16xf32>
    %58 = arith.mulf %44, %52 : vector<16x16xf32>
    %59 = arith.addf %57, %58 : vector<16x16xf32>
    %60 = arith.mulf %59, %56 : vector<16x16xf32>
    %c0_27 = arith.constant 0 : index
    %c0_28 = arith.constant 0 : index
    %61 = vector.load %arg7[%c0_27, %c0_28] : memref<16x16xf32, #tpu.memory_space<vmem>>, vector<16x16xf32>
    %62 = arith.addf %60, %61 : vector<16x16xf32>
    %63 = arith.mulf %44, %48 : vector<16x16xf32>
    %64 = arith.mulf %40, %52 : vector<16x16xf32>
    %65 = arith.subf %63, %64 : vector<16x16xf32>
    %66 = arith.mulf %65, %56 : vector<16x16xf32>
    %c0_29 = arith.constant 0 : index
    %c0_30 = arith.constant 0 : index
    %c0_31 = arith.constant 0 : index
    %67 = vector.load %arg10[%c0_29, %c0_30, %c0_31] : memref<6x16x16xbf16, #tpu.memory_space<vmem>>, vector<1x16x16xbf16>
    %68 = vector.shape_cast %67 : vector<1x16x16xbf16> to vector<16x16xbf16>
    %c1_32 = arith.constant 1 : index
    %c0_33 = arith.constant 0 : index
    %c0_34 = arith.constant 0 : index
    %69 = vector.load %arg10[%c1_32, %c0_33, %c0_34] : memref<6x16x16xbf16, #tpu.memory_space<vmem>>, vector<1x16x16xbf16>
    %70 = vector.shape_cast %69 : vector<1x16x16xbf16> to vector<16x16xbf16>
    %c2 = arith.constant 2 : index
    %c0_35 = arith.constant 0 : index
    %c0_36 = arith.constant 0 : index
    %71 = vector.load %arg10[%c2, %c0_35, %c0_36] : memref<6x16x16xbf16, #tpu.memory_space<vmem>>, vector<1x16x16xbf16>
    %72 = vector.shape_cast %71 : vector<1x16x16xbf16> to vector<16x16xbf16>
    %c3 = arith.constant 3 : index
    %c0_37 = arith.constant 0 : index
    %c0_38 = arith.constant 0 : index
    %73 = vector.load %arg10[%c3, %c0_37, %c0_38] : memref<6x16x16xbf16, #tpu.memory_space<vmem>>, vector<1x16x16xbf16>
    %74 = vector.shape_cast %73 : vector<1x16x16xbf16> to vector<16x16xbf16>
    %c4 = arith.constant 4 : index
    %c0_39 = arith.constant 0 : index
    %c0_40 = arith.constant 0 : index
    %75 = vector.load %arg10[%c4, %c0_39, %c0_40] : memref<6x16x16xbf16, #tpu.memory_space<vmem>>, vector<1x16x16xbf16>
    %76 = vector.shape_cast %75 : vector<1x16x16xbf16> to vector<16x16xbf16>
    %c5 = arith.constant 5 : index
    %c0_41 = arith.constant 0 : index
    %c0_42 = arith.constant 0 : index
    %77 = vector.load %arg10[%c5, %c0_41, %c0_42] : memref<6x16x16xbf16, #tpu.memory_space<vmem>>, vector<1x16x16xbf16>
    %78 = vector.shape_cast %77 : vector<1x16x16xbf16> to vector<16x16xbf16>
    %c0_43 = arith.constant 0 : index
    %c0_44 = arith.constant 0 : index
    %c0_45 = arith.constant 0 : index
    %79 = vector.load %arg11[%c0_43, %c0_44, %c0_45] : memref<6x16x16xbf16, #tpu.memory_space<vmem>>, vector<1x16x16xbf16>
    %80 = vector.shape_cast %79 : vector<1x16x16xbf16> to vector<16x16xbf16>
    %c1_46 = arith.constant 1 : index
    %c0_47 = arith.constant 0 : index
    %c0_48 = arith.constant 0 : index
    %81 = vector.load %arg11[%c1_46, %c0_47, %c0_48] : memref<6x16x16xbf16, #tpu.memory_space<vmem>>, vector<1x16x16xbf16>
    %82 = vector.shape_cast %81 : vector<1x16x16xbf16> to vector<16x16xbf16>
    %c2_49 = arith.constant 2 : index
    %c0_50 = arith.constant 0 : index
    %c0_51 = arith.constant 0 : index
    %83 = vector.load %arg11[%c2_49, %c0_50, %c0_51] : memref<6x16x16xbf16, #tpu.memory_space<vmem>>, vector<1x16x16xbf16>
    %84 = vector.shape_cast %83 : vector<1x16x16xbf16> to vector<16x16xbf16>
    %c3_52 = arith.constant 3 : index
    %c0_53 = arith.constant 0 : index
    %c0_54 = arith.constant 0 : index
    %85 = vector.load %arg11[%c3_52, %c0_53, %c0_54] : memref<6x16x16xbf16, #tpu.memory_space<vmem>>, vector<1x16x16xbf16>
    %86 = vector.shape_cast %85 : vector<1x16x16xbf16> to vector<16x16xbf16>
    %c4_55 = arith.constant 4 : index
    %c0_56 = arith.constant 0 : index
    %c0_57 = arith.constant 0 : index
    %87 = vector.load %arg11[%c4_55, %c0_56, %c0_57] : memref<6x16x16xbf16, #tpu.memory_space<vmem>>, vector<1x16x16xbf16>
    %88 = vector.shape_cast %87 : vector<1x16x16xbf16> to vector<16x16xbf16>
    %c5_58 = arith.constant 5 : index
    %c0_59 = arith.constant 0 : index
    %c0_60 = arith.constant 0 : index
    %89 = vector.load %arg11[%c5_58, %c0_59, %c0_60] : memref<6x16x16xbf16, #tpu.memory_space<vmem>>, vector<1x16x16xbf16>
    %90 = vector.shape_cast %89 : vector<1x16x16xbf16> to vector<16x16xbf16>
    %c0_61 = arith.constant 0 : index
    %c0_62 = arith.constant 0 : index
    %c0_63 = arith.constant 0 : index
    %91 = vector.load %arg8[%c0_61, %c0_62, %c0_63] : memref<2x16x16xf32, #tpu.memory_space<vmem>>, vector<1x16x16xf32>
    %92 = vector.shape_cast %91 : vector<1x16x16xf32> to vector<16x16xf32>
    %c0_64 = arith.constant 0 : index
    %c0_65 = arith.constant 0 : index
    %c0_66 = arith.constant 0 : index
    %93 = vector.load %arg9[%c0_64, %c0_65, %c0_66] : memref<2x16x16xf32, #tpu.memory_space<vmem>>, vector<1x16x16xf32>
    %94 = vector.shape_cast %93 : vector<1x16x16xf32> to vector<16x16xf32>
    %95 = arith.mulf %62, %92 : vector<16x16xf32>
    %96 = arith.mulf %66, %94 : vector<16x16xf32>
    %97 = arith.subf %95, %96 : vector<16x16xf32>
    %98 = arith.mulf %62, %94 : vector<16x16xf32>
    %99 = arith.mulf %66, %92 : vector<16x16xf32>
    %100 = arith.addf %98, %99 : vector<16x16xf32>
    %101 = arith.truncf %97 : vector<16x16xf32> to vector<16x16xbf16>
    %102 = arith.extf %101 : vector<16x16xbf16> to vector<16x16xf32>
    %103 = arith.subf %97, %102 : vector<16x16xf32>
    %104 = arith.truncf %103 : vector<16x16xf32> to vector<16x16xbf16>
    %cst_67 = arith.constant dense<0.000000e+00> : vector<16x16xf32>
    %105 = tpu.matmul %68, %101, %cst_67 {dimension_numbers = #tpu.dot_dimension_numbers<[1], [0], [0], [1], [0, 0, 1, 1], [], []>} : vector<16x16xbf16>, vector<16x16xbf16>, vector<16x16xf32> -> vector<16x16xf32>
    %cst_68 = arith.constant dense<0.000000e+00> : vector<16x16xf32>
    %106 = tpu.matmul %68, %104, %cst_68 {dimension_numbers = #tpu.dot_dimension_numbers<[1], [0], [0], [1], [0, 0, 1, 1], [], []>} : vector<16x16xbf16>, vector<16x16xbf16>, vector<16x16xf32> -> vector<16x16xf32>
    %107 = arith.addf %105, %106 : vector<16x16xf32>
    %cst_69 = arith.constant dense<0.000000e+00> : vector<16x16xf32>
    %108 = tpu.matmul %70, %101, %cst_69 {dimension_numbers = #tpu.dot_dimension_numbers<[1], [0], [0], [1], [0, 0, 1, 1], [], []>} : vector<16x16xbf16>, vector<16x16xbf16>, vector<16x16xf32> -> vector<16x16xf32>
    %109 = arith.addf %107, %108 : vector<16x16xf32>
    %110 = arith.truncf %100 : vector<16x16xf32> to vector<16x16xbf16>
    %111 = arith.extf %110 : vector<16x16xbf16> to vector<16x16xf32>
    %112 = arith.subf %100, %111 : vector<16x16xf32>
    %113 = arith.truncf %112 : vector<16x16xf32> to vector<16x16xbf16>
    %cst_70 = arith.constant dense<0.000000e+00> : vector<16x16xf32>
    %114 = tpu.matmul %72, %110, %cst_70 {dimension_numbers = #tpu.dot_dimension_numbers<[1], [0], [0], [1], [0, 0, 1, 1], [], []>} : vector<16x16xbf16>, vector<16x16xbf16>, vector<16x16xf32> -> vector<16x16xf32>
    %cst_71 = arith.constant dense<0.000000e+00> : vector<16x16xf32>
    %115 = tpu.matmul %72, %113, %cst_71 {dimension_numbers = #tpu.dot_dimension_numbers<[1], [0], [0], [1], [0, 0, 1, 1], [], []>} : vector<16x16xbf16>, vector<16x16xbf16>, vector<16x16xf32> -> vector<16x16xf32>
    %116 = arith.addf %114, %115 : vector<16x16xf32>
    %cst_72 = arith.constant dense<0.000000e+00> : vector<16x16xf32>
    %117 = tpu.matmul %74, %110, %cst_72 {dimension_numbers = #tpu.dot_dimension_numbers<[1], [0], [0], [1], [0, 0, 1, 1], [], []>} : vector<16x16xbf16>, vector<16x16xbf16>, vector<16x16xf32> -> vector<16x16xf32>
    %118 = arith.addf %116, %117 : vector<16x16xf32>
    %119 = arith.addf %97, %100 : vector<16x16xf32>
    %120 = arith.truncf %119 : vector<16x16xf32> to vector<16x16xbf16>
    %121 = arith.extf %120 : vector<16x16xbf16> to vector<16x16xf32>
    %122 = arith.subf %119, %121 : vector<16x16xf32>
    %123 = arith.truncf %122 : vector<16x16xf32> to vector<16x16xbf16>
    %cst_73 = arith.constant dense<0.000000e+00> : vector<16x16xf32>
    %124 = tpu.matmul %76, %120, %cst_73 {dimension_numbers = #tpu.dot_dimension_numbers<[1], [0], [0], [1], [0, 0, 1, 1], [], []>} : vector<16x16xbf16>, vector<16x16xbf16>, vector<16x16xf32> -> vector<16x16xf32>
    %cst_74 = arith.constant dense<0.000000e+00> : vector<16x16xf32>
    %125 = tpu.matmul %76, %123, %cst_74 {dimension_numbers = #tpu.dot_dimension_numbers<[1], [0], [0], [1], [0, 0, 1, 1], [], []>} : vector<16x16xbf16>, vector<16x16xbf16>, vector<16x16xf32> -> vector<16x16xf32>
    %126 = arith.addf %124, %125 : vector<16x16xf32>
    %cst_75 = arith.constant dense<0.000000e+00> : vector<16x16xf32>
    %127 = tpu.matmul %78, %120, %cst_75 {dimension_numbers = #tpu.dot_dimension_numbers<[1], [0], [0], [1], [0, 0, 1, 1], [], []>} : vector<16x16xbf16>, vector<16x16xbf16>, vector<16x16xf32> -> vector<16x16xf32>
    %128 = arith.addf %126, %127 : vector<16x16xf32>
    %129 = arith.subf %109, %118 : vector<16x16xf32>
    %130 = arith.subf %128, %109 : vector<16x16xf32>
    %131 = arith.subf %130, %118 : vector<16x16xf32>
    %132 = arith.truncf %129 : vector<16x16xf32> to vector<16x16xbf16>
    %133 = arith.extf %132 : vector<16x16xbf16> to vector<16x16xf32>
    %134 = arith.subf %129, %133 : vector<16x16xf32>
    %135 = arith.truncf %134 : vector<16x16xf32> to vector<16x16xbf16>
    %cst_76 = arith.constant dense<0.000000e+00> : vector<16x16xf32>
    %136 = tpu.matmul %132, %80, %cst_76 {dimension_numbers = #tpu.dot_dimension_numbers<[1], [0], [0], [1], [0, 0, 1, 1], [], []>} : vector<16x16xbf16>, vector<16x16xbf16>, vector<16x16xf32> -> vector<16x16xf32>
    %cst_77 = arith.constant dense<0.000000e+00> : vector<16x16xf32>
    %137 = tpu.matmul %135, %80, %cst_77 {dimension_numbers = #tpu.dot_dimension_numbers<[1], [0], [0], [1], [0, 0, 1, 1], [], []>} : vector<16x16xbf16>, vector<16x16xbf16>, vector<16x16xf32> -> vector<16x16xf32>
    %138 = arith.addf %136, %137 : vector<16x16xf32>
    %cst_78 = arith.constant dense<0.000000e+00> : vector<16x16xf32>
    %139 = tpu.matmul %132, %82, %cst_78 {dimension_numbers = #tpu.dot_dimension_numbers<[1], [0], [0], [1], [0, 0, 1, 1], [], []>} : vector<16x16xbf16>, vector<16x16xbf16>, vector<16x16xf32> -> vector<16x16xf32>
    %140 = arith.addf %138, %139 : vector<16x16xf32>
    %141 = arith.truncf %131 : vector<16x16xf32> to vector<16x16xbf16>
    %142 = arith.extf %141 : vector<16x16xbf16> to vector<16x16xf32>
    %143 = arith.subf %131, %142 : vector<16x16xf32>
    %144 = arith.truncf %143 : vector<16x16xf32> to vector<16x16xbf16>
    %cst_79 = arith.constant dense<0.000000e+00> : vector<16x16xf32>
    %145 = tpu.matmul %141, %84, %cst_79 {dimension_numbers = #tpu.dot_dimension_numbers<[1], [0], [0], [1], [0, 0, 1, 1], [], []>} : vector<16x16xbf16>, vector<16x16xbf16>, vector<16x16xf32> -> vector<16x16xf32>
    %cst_80 = arith.constant dense<0.000000e+00> : vector<16x16xf32>
    %146 = tpu.matmul %144, %84, %cst_80 {dimension_numbers = #tpu.dot_dimension_numbers<[1], [0], [0], [1], [0, 0, 1, 1], [], []>} : vector<16x16xbf16>, vector<16x16xbf16>, vector<16x16xf32> -> vector<16x16xf32>
    %147 = arith.addf %145, %146 : vector<16x16xf32>
    %cst_81 = arith.constant dense<0.000000e+00> : vector<16x16xf32>
    %148 = tpu.matmul %141, %86, %cst_81 {dimension_numbers = #tpu.dot_dimension_numbers<[1], [0], [0], [1], [0, 0, 1, 1], [], []>} : vector<16x16xbf16>, vector<16x16xbf16>, vector<16x16xf32> -> vector<16x16xf32>
    %149 = arith.addf %147, %148 : vector<16x16xf32>
    %150 = arith.addf %129, %131 : vector<16x16xf32>
    %151 = arith.truncf %150 : vector<16x16xf32> to vector<16x16xbf16>
    %152 = arith.extf %151 : vector<16x16xbf16> to vector<16x16xf32>
    %153 = arith.subf %150, %152 : vector<16x16xf32>
    %154 = arith.truncf %153 : vector<16x16xf32> to vector<16x16xbf16>
    %cst_82 = arith.constant dense<0.000000e+00> : vector<16x16xf32>
    %155 = tpu.matmul %151, %88, %cst_82 {dimension_numbers = #tpu.dot_dimension_numbers<[1], [0], [0], [1], [0, 0, 1, 1], [], []>} : vector<16x16xbf16>, vector<16x16xbf16>, vector<16x16xf32> -> vector<16x16xf32>
    %cst_83 = arith.constant dense<0.000000e+00> : vector<16x16xf32>
    %156 = tpu.matmul %154, %88, %cst_83 {dimension_numbers = #tpu.dot_dimension_numbers<[1], [0], [0], [1], [0, 0, 1, 1], [], []>} : vector<16x16xbf16>, vector<16x16xbf16>, vector<16x16xf32> -> vector<16x16xf32>
    %157 = arith.addf %155, %156 : vector<16x16xf32>
    %cst_84 = arith.constant dense<0.000000e+00> : vector<16x16xf32>
    %158 = tpu.matmul %151, %90, %cst_84 {dimension_numbers = #tpu.dot_dimension_numbers<[1], [0], [0], [1], [0, 0, 1, 1], [], []>} : vector<16x16xbf16>, vector<16x16xbf16>, vector<16x16xf32> -> vector<16x16xf32>
    %159 = arith.addf %157, %158 : vector<16x16xf32>
    %160 = arith.subf %140, %149 : vector<16x16xf32>
    %161 = arith.subf %159, %140 : vector<16x16xf32>
    %162 = arith.subf %161, %149 : vector<16x16xf32>
    %c0_85 = arith.constant 0 : index
    %c0_86 = arith.constant 0 : index
    %c0_87 = arith.constant 0 : index
    %c0_88 = arith.constant 0 : index
    %163 = vector.load %arg12[%c0_85, %c0_86, %c0_87, %c0_88] : memref<1x2x16x16xf32, #tpu.memory_space<vmem>>, vector<1x1x16x16xf32>
    %164 = vector.shape_cast %163 : vector<1x1x16x16xf32> to vector<16x16xf32>
    %165 = vector.shape_cast %160 : vector<16x16xf32> to vector<1x1x16x16xf32>
    tpu.vector_store %arg12[%c0_85, %c0_86, %c0_87, %c0_88], %165 {strides = array<i32>} : memref<1x2x16x16xf32, #tpu.memory_space<vmem>>, vector<1x1x16x16xf32>,
    %c0_89 = arith.constant 0 : index
    %c0_90 = arith.constant 0 : index
    %c0_91 = arith.constant 0 : index
    %c0_92 = arith.constant 0 : index
    %166 = vector.load %arg13[%c0_89, %c0_90, %c0_91, %c0_92] : memref<1x2x16x16xf32, #tpu.memory_space<vmem>>, vector<1x1x16x16xf32>
    %167 = vector.shape_cast %166 : vector<1x1x16x16xf32> to vector<16x16xf32>
    %168 = vector.shape_cast %162 : vector<16x16xf32> to vector<1x1x16x16xf32>
    tpu.vector_store %arg13[%c0_89, %c0_90, %c0_91, %c0_92], %168 {strides = array<i32>} : memref<1x2x16x16xf32, #tpu.memory_space<vmem>>, vector<1x1x16x16xf32>,
    %c1_93 = arith.constant 1 : index
    %c0_94 = arith.constant 0 : index
    %c0_95 = arith.constant 0 : index
    %169 = vector.load %arg8[%c1_93, %c0_94, %c0_95] : memref<2x16x16xf32, #tpu.memory_space<vmem>>, vector<1x16x16xf32>
    %170 = vector.shape_cast %169 : vector<1x16x16xf32> to vector<16x16xf32>
    %c1_96 = arith.constant 1 : index
    %c0_97 = arith.constant 0 : index
    %c0_98 = arith.constant 0 : index
    %171 = vector.load %arg9[%c1_96, %c0_97, %c0_98] : memref<2x16x16xf32, #tpu.memory_space<vmem>>, vector<1x16x16xf32>
    %172 = vector.shape_cast %171 : vector<1x16x16xf32> to vector<16x16xf32>
    %173 = arith.mulf %62, %170 : vector<16x16xf32>
    %174 = arith.mulf %66, %172 : vector<16x16xf32>
    %175 = arith.subf %173, %174 : vector<16x16xf32>
    %176 = arith.mulf %62, %172 : vector<16x16xf32>
    %177 = arith.mulf %66, %170 : vector<16x16xf32>
    %178 = arith.addf %176, %177 : vector<16x16xf32>
    %179 = arith.truncf %175 : vector<16x16xf32> to vector<16x16xbf16>
    %180 = arith.extf %179 : vector<16x16xbf16> to vector<16x16xf32>
    %181 = arith.subf %175, %180 : vector<16x16xf32>
    %182 = arith.truncf %181 : vector<16x16xf32> to vector<16x16xbf16>
    %cst_99 = arith.constant dense<0.000000e+00> : vector<16x16xf32>
    %183 = tpu.matmul %68, %179, %cst_99 {dimension_numbers = #tpu.dot_dimension_numbers<[1], [0], [0], [1], [0, 0, 1, 1], [], []>} : vector<16x16xbf16>, vector<16x16xbf16>, vector<16x16xf32> -> vector<16x16xf32>
    %cst_100 = arith.constant dense<0.000000e+00> : vector<16x16xf32>
    %184 = tpu.matmul %68, %182, %cst_100 {dimension_numbers = #tpu.dot_dimension_numbers<[1], [0], [0], [1], [0, 0, 1, 1], [], []>} : vector<16x16xbf16>, vector<16x16xbf16>, vector<16x16xf32> -> vector<16x16xf32>
    %185 = arith.addf %183, %184 : vector<16x16xf32>
    %cst_101 = arith.constant dense<0.000000e+00> : vector<16x16xf32>
    %186 = tpu.matmul %70, %179, %cst_101 {dimension_numbers = #tpu.dot_dimension_numbers<[1], [0], [0], [1], [0, 0, 1, 1], [], []>} : vector<16x16xbf16>, vector<16x16xbf16>, vector<16x16xf32> -> vector<16x16xf32>
    %187 = arith.addf %185, %186 : vector<16x16xf32>
    %188 = arith.truncf %178 : vector<16x16xf32> to vector<16x16xbf16>
    %189 = arith.extf %188 : vector<16x16xbf16> to vector<16x16xf32>
    %190 = arith.subf %178, %189 : vector<16x16xf32>
    %191 = arith.truncf %190 : vector<16x16xf32> to vector<16x16xbf16>
    %cst_102 = arith.constant dense<0.000000e+00> : vector<16x16xf32>
    %192 = tpu.matmul %72, %188, %cst_102 {dimension_numbers = #tpu.dot_dimension_numbers<[1], [0], [0], [1], [0, 0, 1, 1], [], []>} : vector<16x16xbf16>, vector<16x16xbf16>, vector<16x16xf32> -> vector<16x16xf32>
    %cst_103 = arith.constant dense<0.000000e+00> : vector<16x16xf32>
    %193 = tpu.matmul %72, %191, %cst_103 {dimension_numbers = #tpu.dot_dimension_numbers<[1], [0], [0], [1], [0, 0, 1, 1], [], []>} : vector<16x16xbf16>, vector<16x16xbf16>, vector<16x16xf32> -> vector<16x16xf32>
    %194 = arith.addf %192, %193 : vector<16x16xf32>
    %cst_104 = arith.constant dense<0.000000e+00> : vector<16x16xf32>
    %195 = tpu.matmul %74, %188, %cst_104 {dimension_numbers = #tpu.dot_dimension_numbers<[1], [0], [0], [1], [0, 0, 1, 1], [], []>} : vector<16x16xbf16>, vector<16x16xbf16>, vector<16x16xf32> -> vector<16x16xf32>
    %196 = arith.addf %194, %195 : vector<16x16xf32>
    %197 = arith.addf %175, %178 : vector<16x16xf32>
    %198 = arith.truncf %197 : vector<16x16xf32> to vector<16x16xbf16>
    %199 = arith.extf %198 : vector<16x16xbf16> to vector<16x16xf32>
    %200 = arith.subf %197, %199 : vector<16x16xf32>
    %201 = arith.truncf %200 : vector<16x16xf32> to vector<16x16xbf16>
    %cst_105 = arith.constant dense<0.000000e+00> : vector<16x16xf32>
    %202 = tpu.matmul %76, %198, %cst_105 {dimension_numbers = #tpu.dot_dimension_numbers<[1], [0], [0], [1], [0, 0, 1, 1], [], []>} : vector<16x16xbf16>, vector<16x16xbf16>, vector<16x16xf32> -> vector<16x16xf32>
    %cst_106 = arith.constant dense<0.000000e+00> : vector<16x16xf32>
    %203 = tpu.matmul %76, %201, %cst_106 {dimension_numbers = #tpu.dot_dimension_numbers<[1], [0], [0], [1], [0, 0, 1, 1], [], []>} : vector<16x16xbf16>, vector<16x16xbf16>, vector<16x16xf32> -> vector<16x16xf32>
    %204 = arith.addf %202, %203 : vector<16x16xf32>
    %cst_107 = arith.constant dense<0.000000e+00> : vector<16x16xf32>
    %205 = tpu.matmul %78, %198, %cst_107 {dimension_numbers = #tpu.dot_dimension_numbers<[1], [0], [0], [1], [0, 0, 1, 1], [], []>} : vector<16x16xbf16>, vector<16x16xbf16>, vector<16x16xf32> -> vector<16x16xf32>
    %206 = arith.addf %204, %205 : vector<16x16xf32>
    %207 = arith.subf %187, %196 : vector<16x16xf32>
    %208 = arith.subf %206, %187 : vector<16x16xf32>
    %209 = arith.subf %208, %196 : vector<16x16xf32>
    %210 = arith.truncf %207 : vector<16x16xf32> to vector<16x16xbf16>
    %211 = arith.extf %210 : vector<16x16xbf16> to vector<16x16xf32>
    %212 = arith.subf %207, %211 : vector<16x16xf32>
    %213 = arith.truncf %212 : vector<16x16xf32> to vector<16x16xbf16>
    %cst_108 = arith.constant dense<0.000000e+00> : vector<16x16xf32>
    %214 = tpu.matmul %210, %80, %cst_108 {dimension_numbers = #tpu.dot_dimension_numbers<[1], [0], [0], [1], [0, 0, 1, 1], [], []>} : vector<16x16xbf16>, vector<16x16xbf16>, vector<16x16xf32> -> vector<16x16xf32>
    %cst_109 = arith.constant dense<0.000000e+00> : vector<16x16xf32>
    %215 = tpu.matmul %213, %80, %cst_109 {dimension_numbers = #tpu.dot_dimension_numbers<[1], [0], [0], [1], [0, 0, 1, 1], [], []>} : vector<16x16xbf16>, vector<16x16xbf16>, vector<16x16xf32> -> vector<16x16xf32>
    %216 = arith.addf %214, %215 : vector<16x16xf32>
    %cst_110 = arith.constant dense<0.000000e+00> : vector<16x16xf32>
    %217 = tpu.matmul %210, %82, %cst_110 {dimension_numbers = #tpu.dot_dimension_numbers<[1], [0], [0], [1], [0, 0, 1, 1], [], []>} : vector<16x16xbf16>, vector<16x16xbf16>, vector<16x16xf32> -> vector<16x16xf32>
    %218 = arith.addf %216, %217 : vector<16x16xf32>
    %219 = arith.truncf %209 : vector<16x16xf32> to vector<16x16xbf16>
    %220 = arith.extf %219 : vector<16x16xbf16> to vector<16x16xf32>
    %221 = arith.subf %209, %220 : vector<16x16xf32>
    %222 = arith.truncf %221 : vector<16x16xf32> to vector<16x16xbf16>
    %cst_111 = arith.constant dense<0.000000e+00> : vector<16x16xf32>
    %223 = tpu.matmul %219, %84, %cst_111 {dimension_numbers = #tpu.dot_dimension_numbers<[1], [0], [0], [1], [0, 0, 1, 1], [], []>} : vector<16x16xbf16>, vector<16x16xbf16>, vector<16x16xf32> -> vector<16x16xf32>
    %cst_112 = arith.constant dense<0.000000e+00> : vector<16x16xf32>
    %224 = tpu.matmul %222, %84, %cst_112 {dimension_numbers = #tpu.dot_dimension_numbers<[1], [0], [0], [1], [0, 0, 1, 1], [], []>} : vector<16x16xbf16>, vector<16x16xbf16>, vector<16x16xf32> -> vector<16x16xf32>
    %225 = arith.addf %223, %224 : vector<16x16xf32>
    %cst_113 = arith.constant dense<0.000000e+00> : vector<16x16xf32>
    %226 = tpu.matmul %219, %86, %cst_113 {dimension_numbers = #tpu.dot_dimension_numbers<[1], [0], [0], [1], [0, 0, 1, 1], [], []>} : vector<16x16xbf16>, vector<16x16xbf16>, vector<16x16xf32> -> vector<16x16xf32>
    %227 = arith.addf %225, %226 : vector<16x16xf32>
    %228 = arith.addf %207, %209 : vector<16x16xf32>
    %229 = arith.truncf %228 : vector<16x16xf32> to vector<16x16xbf16>
    %230 = arith.extf %229 : vector<16x16xbf16> to vector<16x16xf32>
    %231 = arith.subf %228, %230 : vector<16x16xf32>
    %232 = arith.truncf %231 : vector<16x16xf32> to vector<16x16xbf16>
    %cst_114 = arith.constant dense<0.000000e+00> : vector<16x16xf32>
    %233 = tpu.matmul %229, %88, %cst_114 {dimension_numbers = #tpu.dot_dimension_numbers<[1], [0], [0], [1], [0, 0, 1, 1], [], []>} : vector<16x16xbf16>, vector<16x16xbf16>, vector<16x16xf32> -> vector<16x16xf32>
    %cst_115 = arith.constant dense<0.000000e+00> : vector<16x16xf32>
    %234 = tpu.matmul %232, %88, %cst_115 {dimension_numbers = #tpu.dot_dimension_numbers<[1], [0], [0], [1], [0, 0, 1, 1], [], []>} : vector<16x16xbf16>, vector<16x16xbf16>, vector<16x16xf32> -> vector<16x16xf32>
    %235 = arith.addf %233, %234 : vector<16x16xf32>
    %cst_116 = arith.constant dense<0.000000e+00> : vector<16x16xf32>
    %236 = tpu.matmul %229, %90, %cst_116 {dimension_numbers = #tpu.dot_dimension_numbers<[1], [0], [0], [1], [0, 0, 1, 1], [], []>} : vector<16x16xbf16>, vector<16x16xbf16>, vector<16x16xf32> -> vector<16x16xf32>
    %237 = arith.addf %235, %236 : vector<16x16xf32>
    %238 = arith.subf %218, %227 : vector<16x16xf32>
    %239 = arith.subf %237, %218 : vector<16x16xf32>
    %240 = arith.subf %239, %227 : vector<16x16xf32>
    %c0_117 = arith.constant 0 : index
    %c1_118 = arith.constant 1 : index
    %c0_119 = arith.constant 0 : index
    %c0_120 = arith.constant 0 : index
    %241 = vector.load %arg12[%c0_117, %c1_118, %c0_119, %c0_120] : memref<1x2x16x16xf32, #tpu.memory_space<vmem>>, vector<1x1x16x16xf32>
    %242 = vector.shape_cast %241 : vector<1x1x16x16xf32> to vector<16x16xf32>
    %243 = vector.shape_cast %238 : vector<16x16xf32> to vector<1x1x16x16xf32>
    tpu.vector_store %arg12[%c0_117, %c1_118, %c0_119, %c0_120], %243 {strides = array<i32>} : memref<1x2x16x16xf32, #tpu.memory_space<vmem>>, vector<1x1x16x16xf32>,
    %c0_121 = arith.constant 0 : index
    %c1_122 = arith.constant 1 : index
    %c0_123 = arith.constant 0 : index
    %c0_124 = arith.constant 0 : index
    %244 = vector.load %arg13[%c0_121, %c1_122, %c0_123, %c0_124] : memref<1x2x16x16xf32, #tpu.memory_space<vmem>>, vector<1x1x16x16xf32>
    %245 = vector.shape_cast %244 : vector<1x1x16x16xf32> to vector<16x16xf32>
    %246 = vector.shape_cast %240 : vector<16x16xf32> to vector<1x1x16x16xf32>
    tpu.vector_store %arg13[%c0_121, %c1_122, %c0_123, %c0_124], %246 {strides = array<i32>} : memref<1x2x16x16xf32, #tpu.memory_space<vmem>>, vector<1x1x16x16xf32>,
    return
  }
  func.func @transform_0(%arg0: i32, %arg1: i32) -> (i32, i32) {
    %c0_i32 = arith.constant 0 : i32
    %c0_i32_0 = arith.constant 0 : i32
    %c0_i32_1 = arith.constant 0 : i32
    return %c0_i32, %c0_i32_0 : i32, i32
  }
  func.func @transform_1(%arg0: i32, %arg1: i32) -> (i32, i32, i32) {
    %c0_i32 = arith.constant 0 : i32
    %c0_i32_0 = arith.constant 0 : i32
    %c0_i32_1 = arith.constant 0 : i32
    %c0_i32_2 = arith.constant 0 : i32
    return %c0_i32, %c0_i32_0, %c0_i32_1 : i32, i32, i32
  }
  func.func @transform_2(%arg0: i32, %arg1: i32) -> (i32, i32, i32) {
    %c0_i32 = arith.constant 0 : i32
    %c0_i32_0 = arith.constant 0 : i32
    %c0_i32_1 = arith.constant 0 : i32
    %c0_i32_2 = arith.constant 0 : i32
    return %c0_i32, %c0_i32_0, %c0_i32_1 : i32, i32, i32
  }
  func.func @transform_3(%arg0: i32, %arg1: i32) -> (i32, i32) {
    %c0_i32 = arith.constant 0 : i32
    %c0_i32_0 = arith.constant 0 : i32
    %c0_i32_1 = arith.constant 0 : i32
    return %c0_i32, %c0_i32_0 : i32, i32
  }
  func.func @transform_4(%arg0: i32, %arg1: i32) -> (i32, i32) {
    %c0_i32 = arith.constant 0 : i32
    %c0_i32_0 = arith.constant 0 : i32
    %c0_i32_1 = arith.constant 0 : i32
    return %c0_i32, %c0_i32_0 : i32, i32
  }
  func.func @transform_5(%arg0: i32, %arg1: i32) -> (i32, i32) {
    %c0_i32 = arith.constant 0 : i32
    %c0_i32_0 = arith.constant 0 : i32
    %c0_i32_1 = arith.constant 0 : i32
    return %c0_i32, %c0_i32_0 : i32, i32
  }
  func.func @transform_6(%arg0: i32, %arg1: i32) -> (i32, i32, i32) {
    %c0_i32 = arith.constant 0 : i32
    %c0_i32_0 = arith.constant 0 : i32
    %c0_i32_1 = arith.constant 0 : i32
    return %arg0, %c0_i32, %c0_i32_0 : i32, i32, i32
  }
  func.func @transform_7(%arg0: i32, %arg1: i32) -> (i32, i32, i32) {
    %c0_i32 = arith.constant 0 : i32
    %c0_i32_0 = arith.constant 0 : i32
    %c0_i32_1 = arith.constant 0 : i32
    return %arg0, %c0_i32, %c0_i32_0 : i32, i32, i32
  }
  func.func @transform_8(%arg0: i32, %arg1: i32) -> (i32, i32, i32) {
    %c0_i32 = arith.constant 0 : i32
    %c0_i32_0 = arith.constant 0 : i32
    %c0_i32_1 = arith.constant 0 : i32
    %c0_i32_2 = arith.constant 0 : i32
    return %c0_i32, %c0_i32_0, %c0_i32_1 : i32, i32, i32
  }
  func.func @transform_9(%arg0: i32, %arg1: i32) -> (i32, i32, i32) {
    %c0_i32 = arith.constant 0 : i32
    %c0_i32_0 = arith.constant 0 : i32
    %c0_i32_1 = arith.constant 0 : i32
    %c0_i32_2 = arith.constant 0 : i32
    return %c0_i32, %c0_i32_0, %c0_i32_1 : i32, i32, i32
  }
  func.func @transform_10(%arg0: i32, %arg1: i32) -> (i32, i32, i32, i32) {
    %c0_i32 = arith.constant 0 : i32
    %c0_i32_0 = arith.constant 0 : i32
    %c0_i32_1 = arith.constant 0 : i32
    return %arg1, %arg0, %c0_i32, %c0_i32_0 : i32, i32, i32, i32
  }
  func.func @transform_11(%arg0: i32, %arg1: i32) -> (i32, i32, i32, i32) {
    %c0_i32 = arith.constant 0 : i32
    %c0_i32_0 = arith.constant 0 : i32
    %c0_i32_1 = arith.constant 0 : i32
    return %arg1, %arg0, %c0_i32, %c0_i32_0 : i32, i32, i32, i32
  }
}

</mosaic_0001>

<bundles_post_ra>
// kernel: tpu_custom_call.1
= control target key start
LH: loop header
LB: loop body
LE: loop exit
PB: predicated region body
PF: predicated region fallthrough
CT: control target
= control target key end

     0   :  { %s5246_s0 = inlined_call_operand.vmem [shape: f32[8,2], index: 0, kind: input, shape index: {}]   ;;  %s5247_s1 = inlined_call_operand.hbm [shape: f32[2,16,16], index: 1, kind: input, shape index: {}]   ;;  %s5248_s2 = inlined_call_operand.hbm [shape: f32[2,16,16], index: 2, kind: input, shape index: {}]   ;;  %s5249_s3 = inlined_call_operand.vmem [shape: f32[16,16], index: 3, kind: input, shape index: {}]   ;;  %s5250_s4 = inlined_call_operand.hbm [shape: f32[16,16], index: 4, kind: input, shape index: {}]   ;;  %s5251_s5 = inlined_call_operand.hbm [shape: f32[16,16], index: 5, kind: input, shape index: {}]   ;;  %s5252_s6 = inlined_call_operand.hbm [shape: f32[4,16,16], index: 6, kind: input, shape index: {}]   ;;  %s5253_s7 = inlined_call_operand.hbm [shape: f32[4,16,16], index: 7, kind: input, shape index: {}]   ;;  %s5254_s8 = inlined_call_operand.hbm [shape: bf16[6,16,16], index: 8, kind: input, shape index: {}]   ;;  %s5255_s9 = inlined_call_operand.hbm [shape: bf16[6,16,16], index: 9, kind: input, shape index: {}]   ;;  %s5256_s10 = inlined_call_operand.hbm [shape: f32[8,4,16,16], index: 10, kind: output, shape index: {0}]   ;;  %s5257_s11 = inlined_call_operand.hbm [shape: f32[8,4,16,16], index: 11, kind: output, shape index: {1}]  }
   0x1   :  { %5291 = sst [smem:[#allocation42_spill]] %s5246_s0 }
   0x2   :  { %5292 = sst [smem:[#allocation43_spill]] %s5247_s1 }
   0x3   :  { %5293 = sst [smem:[#allocation44_spill]] %s5248_s2 }
   0x4   :  { %5294 = sst [smem:[#allocation45_spill]] %s5249_s3 }
   0x5   :  { %5295 = sst [smem:[#allocation46_spill]] %s5250_s4 }
   0x6   :  { %5296 = sst [smem:[#allocation47_spill]] %s5251_s5 }
   0x7   :  { %5297 = sst [smem:[#allocation48_spill]] %s5252_s6 }
   0x8   :  { %5298 = sst [smem:[#allocation49_spill]] %s5253_s7 }
   0x9   :  { %5299 = sst [smem:[#allocation50_spill]] %s5254_s8 }
   0xa   :  { %5300 = sst [smem:[#allocation51_spill]] %s5255_s9 }
   0xb   :  { %5301 = sst [smem:[#allocation52_spill]] %s5256_s10 }
   0xc   :  { %5302 = sst [smem:[#allocation53_spill]] %s5257_s11 }
   0xd   :  { %17 = vsyncpa [#allocation5], 0 }
   0xe   :  { %18 = vsyncpa [#allocation3], 0 }
   0xf   :  { %19 = vsyncpa [#allocation8], 0 }
  0x10   :  { %20 = vsyncpa [#allocation11], 0 }
  0x11   :  { %21 = vsyncpa [#allocation4], 0 }
  0x12   :  { %23 = vsyncpa [#allocation4 + $0x1], 0 }
  0x13   :  { %24 = vsyncpa [#allocation18], 0 }
  0x14   :  { %26 = vsyncpa [#allocation18 + $0x1], 0  ;;  %s4381_s17 = smov 0   ;;  %s4383_s18 = smov 0  }
  0x15   :  { %s4385_s19 = smov 0   ;;  %s4387_s20 = smov 0  }
  0x16   :  { %s4389_s21 = smov 0   ;;  %s4391_s22 = smov 0  }
  0x17   :  { %s4393_s23 = smov 0   ;;  %s4395_s24 = smov 0  }
  0x18   :  { %s4397_s25 = smov 0   ;;  %s4399_s26 = smov 0  }
  0x19   :  { %s4401_s27 = smov 0  }
  0x1a LB: > { %5303 = sst [smem:[#allocation28_spill]] %s4254_s17  ;;  %s4296_s28 = smov [#allocation6]   ;;  %s4294_s27 = sphi %s4401_s27, %s32_s27   ;;  %s4290_s26 = sphi %s4399_s26, %s5380_s26   ;;  %s4286_s25 = sphi %s4397_s25, %s5373_s25   ;;  %s4282_s24 = sphi %s4395_s24, %s5379_s24   ;;  %s4278_s23 = sphi %s4393_s23, %s5372_s23   ;;  %s4274_s22 = sphi %s4391_s22, %s5371_s22   ;;  %s4270_s21 = sphi %s4389_s21, %s5378_s21   ;;  %s4266_s20 = sphi %s4387_s20, %s5377_s20   ;;  %s4262_s19 = sphi %s4385_s19, %s5369_s19   ;;  %s4258_s18 = sphi %s4383_s18, %s5376_s18   ;;  %s4254_s17 = sphi %s4381_s17, %s5375_s17  }
  0x1b   : > { %5304 = sst [smem:[#allocation29_spill]] %s4262_s19  ;;  %s348_s29 = sshll.u32 %s4296_s28, 4  ;;  %s4442_s29 = int_to_ptr.vmem [resolvable:$true] %s348_s29 }
  0x1c   : > { %5305 = sst [smem:[#allocation30_spill]] %s4274_s22  ;;  %s4437_s30 = sadd.s32 4294967295, %s4294_s27  }
  0x1d   : > { %5306 = sst [smem:[#allocation31_spill]] %s4278_s23  ;;  %p3136_p0 = scmp.ge.s32.totalorder %s4294_s27, 1 }
  0x1e   : > { %5307 = sst [smem:[#allocation32_spill]] %s4282_s24  ;;  %p5266_p1 = scmp.eq.s32.totalorder %s4437_s30, 0 }
  0x1f   : > { %5308 = sst [smem:[#allocation33_spill]] %s4286_s25  ;;  %p325_p2 = scmp.lt.s32.totalorder %s4294_s27, 17 }
  0x20   : > { %5309 = sst [smem:[#allocation34_spill]] %s4294_s27  ;;  %s4297_s13 = smov [#allocation7]  }
  0x21   : > { %p4444_p3 = pnand %p3136_p0, %p325_p2  ;;  %s361_s14 = sshll.u32 %s4297_s13, 4  ;;  %s4456_s14 = int_to_ptr.vmem [resolvable:$true] %s361_s14 }
  0x22   : > { %s4298_s16 = smov [#allocation9]   ;;  %s5313_s1 = sld [smem:[#allocation43_spill]] }
  0x23   : > { %s5310_s12 = scalar_select %p4444_p3, 1, 0 }
  0x24   : > { %p3684_p4 = pneg %p4444_p3  ;;  %s377_s28 = sshll.u32 %s4298_s16, 4  ;;  %s4458_s28 = int_to_ptr.vmem [resolvable:$true] %s377_s28 }
  0x25   : > { %5311 = sst [smem:[#allocation35_spill]] %s5310_s12 }
  0x26   : > { %p4452_p5 = pnand %p3684_p4, %p5266_p1 }
  0x28   : > { %s5312_s15 = scalar_select %p4452_p5, 1, 0 }
  0x29   : > { %s3873_s24 = scalar_lea.hbm %s5313_s1, 512  ;;  %p4468_p7 = pneg %p4452_p5 }
  0x2a   : > { %p3874_p6 = scmp.ne.s32.totalorder %s5313_s1, %s3873_s24  ;;  %p3880_p10 = scmp.lt.u32.totalorder %s3873_s24, %s5313_s1 }
  0x2c   : > { %p3876_p8 = pnand %p4468_p7, %p3874_p6 }
  0x2e   : > { %p3877_p9 = pneg %p3876_p8 }
  0x30   : > { %p3882_p11 = pnand %p3880_p10, %p3877_p9 }
  0x32   : > { %3885 = shalt.err (!%p3882_p11)
}
  0x33   : > { %s3886_s3 = scalar_lea.vmem %s4442_s29, 512  ;;  %p3894_p2 = scmp.lt.s32.totalorder %s4442_s29, %s4442_s29 }
  0x34   : > { %p3887_p12 = scmp.ne.s32.totalorder %s4442_s29, %s3886_s3  ;;  %p3895_p4 = scmp.lt.s32.totalorder %s3886_s3, %s3886_s3 }
  0x36   : > { %p3889_p13 = pnand %p3887_p12, %p4468_p7  ;;  %p3896_p6 = por %p3895_p4, %p3894_p2 }
  0x38   : > { %p3890_p0 = pneg %p3889_p13 }
  0x3a   : > { %p3897_p8 = pnand %p3896_p6, %p3890_p0 }
  0x3c   : > { %3900 = shalt.err (!%p3897_p8)
}
  0x3d   : > { %s5268_s10 = smov 128   ;;  %s5270_s11 = smov 8  }
  0x3e   : > { %3690 = dma.hbm_to_vmem [thread:$0]  (!%p4452_p5), %s5313_s1, 512, %s4442_s29, [#allocation3], %s5268_s10, %s5268_s10, %s5270_s11  }
  0x3f   : > { %s5315_s2 = sld [smem:[#allocation44_spill]] }
  0x45   : > { %s3901_s3 = scalar_lea.hbm %s5315_s2, 512 }
  0x46   : > { %p3902_p9 = scmp.ne.s32.totalorder %s5315_s2, %s3901_s3  ;;  %p3908_p12 = scmp.lt.u32.totalorder %s3901_s3, %s5315_s2 }
  0x48   : > { %p3904_p10 = pnand %p3902_p9, %p4468_p7 }
  0x4a   : > { %p3905_p11 = pneg %p3904_p10 }
  0x4c   : > { %p3910_p13 = pnand %p3908_p12, %p3905_p11 }
  0x4e   : > { %3913 = shalt.err (!%p3910_p13)
}
  0x4f   : > { %s3914_s29 = scalar_lea.vmem %s4456_s14, 512  ;;  %p3922_p6 = scmp.lt.s32.totalorder %s4456_s14, %s4456_s14 }
  0x50   : > { %p3915_p0 = scmp.ne.s32.totalorder %s4456_s14, %s3914_s29  ;;  %p3923_p8 = scmp.lt.s32.totalorder %s3914_s29, %s3914_s29 }
  0x52   : > { %p3917_p2 = pnand %p3915_p0, %p4468_p7  ;;  %p3924_p9 = por %p3923_p8, %p3922_p6 }
  0x54   : > { %p3918_p4 = pneg %p3917_p2 }
  0x56   : > { %p3925_p10 = pnand %p3924_p9, %p3918_p4 }
  0x58   : > { %3928 = shalt.err (!%p3925_p10)
}
  0x59   : > { %3693 = dma.hbm_to_vmem [thread:$0]  (!%p4452_p5), %s5315_s2, 512, %s4456_s14, [#allocation8], %s5268_s10, %s5268_s10, %s5270_s11  }
  0x5a   : > { %s5316_s4 = sld [smem:[#allocation46_spill]] }
  0x60   : > { %s3929_s23 = scalar_lea.hbm %s5316_s4, 256 }
  0x61   : > { %p3930_p11 = scmp.ne.s32.totalorder %s5316_s4, %s3929_s23  ;;  %p3936_p0 = scmp.lt.u32.totalorder %s3929_s23, %s5316_s4 }
  0x63   : > { %p3932_p12 = pnand %p3930_p11, %p4468_p7 }
  0x65   : > { %p3933_p13 = pneg %p3932_p12 }
  0x67   : > { %p3938_p2 = pnand %p3936_p0, %p3933_p13 }
  0x69   : > { %3941 = shalt.err (!%p3938_p2)
}
  0x6a   : > { %s3942_s14 = scalar_lea.vmem %s4458_s28, 256  ;;  %p3950_p9 = scmp.lt.s32.totalorder %s4458_s28, %s4458_s28 }
  0x6b   : > { %p3943_p4 = scmp.ne.s32.totalorder %s4458_s28, %s3942_s14  ;;  %p3951_p10 = scmp.lt.s32.totalorder %s3942_s14, %s3942_s14 }
  0x6d   : > { %p3945_p6 = pnand %p3943_p4, %p4468_p7  ;;  %p3952_p11 = por %p3951_p10, %p3950_p9 }
  0x6f   : > { %p3946_p8 = pneg %p3945_p6 }
  0x71   : > { %p3953_p12 = pnand %p3952_p11, %p3946_p8 }
  0x73   : > { %3956 = shalt.err (!%p3953_p12)
}
  0x74   : > { %3696 = dma.hbm_to_vmem [thread:$0]  (!%p4452_p5), %s5316_s4, 256, %s4458_s28, [#allocation8], %s5268_s10, %s5268_s10, %s5270_s11  }
  0x75   : > { %s4301_s7 = smov [#allocation10]   ;;  %s5317_s5 = sld [smem:[#allocation47_spill]] }
  0x76   : > { %s390_s8 = sshll.u32 %s4301_s7, 4  ;;  %s391_s8 = int_to_ptr.vmem [resolvable:$true] %s390_s8 }
  0x7b   : > { %s3957_s24 = scalar_lea.hbm %s5317_s5, 256 }
  0x7c   : > { %p3958_p13 = scmp.ne.s32.totalorder %s5317_s5, %s3957_s24  ;;  %p3964_p4 = scmp.lt.u32.totalorder %s3957_s24, %s5317_s5 }
  0x7e   : > { %p3960_p0 = pnand %p3958_p13, %p4468_p7 }
  0x80   : > { %p3961_p2 = pneg %p3960_p0 }
  0x82   : > { %p3966_p6 = pnand %p3964_p4, %p3961_p2 }
  0x84   : > { %3969 = shalt.err (!%p3966_p6)
}
  0x85   : > { %s3970_s28 = scalar_lea.vmem %s391_s8, 256  ;;  %p3978_p11 = scmp.lt.s32.totalorder %s391_s8, %s391_s8 }
  0x86   : > { %p3971_p8 = scmp.ne.s32.totalorder %s391_s8, %s3970_s28  ;;  %p3979_p12 = scmp.lt.s32.totalorder %s3970_s28, %s3970_s28 }
  0x88   : > { %p3973_p9 = pnand %p3971_p8, %p4468_p7  ;;  %p3980_p1 = por %p3979_p12, %p3978_p11 }
  0x8a   : > { %p3974_p10 = pneg %p3973_p9 }
  0x8c   : > { %p3981_p3 = pnand %p3980_p1, %p3974_p10 }
  0x8e   : > { %3984 = shalt.err (!%p3981_p3)
}
  0x8f   : > { %3699 = dma.hbm_to_vmem [thread:$0]  (!%p4452_p5), %s5317_s5, 256, %s391_s8, [#allocation11], %s5268_s10, %s5268_s10, %s5270_s11  }
  0x90   : > { %s3135_s7 = sadd.s32 4294967294, %s4294_s27   ;;  %s41_s9 = sadd.s32 1, %s4286_s25 }
  0x91   : > { %p42_p1 = scmp.ge.s32.totalorder %s41_s9, 8  ;;  %s44_s23 = sadd.s32 1, %s4290_s26 }
  0x92   : > { %s177_s24 = sadd.s32 1, %s4274_s22  ;;  %p184_p3 = scmp.ne.s32.totalorder %s4274_s22, %s4270_s21 }
  0x93   : > { %s5382_s9 = smov (%p42_p1, %s41_s9), 0  ;;  %s5384_s23 = smov (!%p42_p1, %s44_s23), %s4290_s26 }
  0x94   : > { %5318 = sst [smem:[#allocation36_spill]] %s5382_s9  ;;  %p185_p13 = scmp.eq.s32.totalorder %s4294_s27, 0 }
  0x95   : > { %p190_p0 = scmp.ne.s32.totalorder %s4270_s21, %s4266_s20  ;;  %p46_p2 = scmp.ge.s32.totalorder %s5384_s23, 2 }
  0x96   : > { %s268_s8 = ssub.s32 %s4286_s25, %s5382_s9  ;;  %p4579_p4 = por %p185_p13, %p184_p3 }
  0x97   : > { %p5320_p6 = scmp.eq.s32.totalorder %s4437_s30, 0  ;;  %s5386_s23 = smov (%p46_p2, %s5384_s23), 0 }
  0x98   : > { %5322 = sst [smem:[#allocation37_spill]] %s5386_s23  ;;  %s273_s20 = sadd.s32 1, %s4262_s19 }
  0x99   : > { %p4585_p8 = por %p5320_p6, %p190_p0  ;;  %p283_p9 = scmp.ne.s32.totalorder %s4262_s19, %s4258_s18 }
  0x9a   : > { %s174_s3 = ssub.s32 %s4290_s26, %s5386_s23  ;;  %p284_p10 = scmp.eq.s32.totalorder %s4437_s30, 15 }
  0x9b   : > { %s5321_s16 = scalar_select %p4585_p8, 1, 0 }
  0x9c   : > { %p175_p11 = scmp.eq.s32.totalorder %s174_s3, 0  ;;  %s270_s14 = sor.u32 %s268_s8, %s174_s3 }
  0x9d   : > { %p271_p12 = scmp.eq.s32.totalorder %s270_s14, 0  ;;  %p4597_p1 = por %p284_p10, %p283_p9 }
  0x9e   : > { %s4602_s29 = scalar_select %p175_p11, %s4274_s22, %s177_s24  }
  0x9f   : > { %s5323_s28 = scalar_select %p4597_p1, 1, 0 }
  0xa0   : > { %5325 = sst [smem:[#allocation39_spill]] %s4602_s29  ;;  %p289_p3 = scmp.ne.s32.totalorder %s4258_s18, %s4254_s17 }
  0xa1   : > { %5324 = sst [smem:[#allocation38_spill]] %s5323_s28  ;;  %p290_p13 = scmp.eq.s32.totalorder %s3135_s7, 15 }
  0xa2   : > { %s4605_s0 = scalar_select %p271_p12, %s4262_s19, %s273_s20  }
  0xa3   : > { %p3727_p0 = scmp.lt.s32.totalorder %s4294_s27, 16  ;;  %s430_s10 = sand.u32 1, %s4294_s27  }
  0xa4   : > { %5326 = sst [smem:[#allocation40_spill]] %s4605_s0  ;;  %p4611_p2 = por %p290_p13, %p289_p3 }
  0xa5   : > { %s432_s1 = sand.u32 1, %s4274_s22   ;;  %s5272_s2 = sshll.u32 %s4290_s26, 9 }
  0xa6   : > { %s5327_s11 = scalar_select %p4611_p2, 1, 0 }
  0xa7   : > { %s4617_s8 = sshll.u32 %s432_s1, 5  ;;  %s5329_s6 = sld [smem:[#allocation48_spill]] }
  0xa8   : > { %5328 = sst [smem:[#allocation41_spill]] %s5327_s11  ;;  %p4628_p6 = pnand %p3727_p0, %p4579_p4 }
  0xa9   : > { %s434_s1 = scalar_lea.vmem [#allocation12], %s4617_s8  ;;  %s4635_s4 = scalar_lea.sflag [#allocation3], %s430_s10 }
  0xaa   : > { %s5330_s7 = scalar_select %p4628_p6, 1, 0 }
  0xab   : > { %s442_s20 = sshll.u32 %s434_s1, 4  ;;  %p5280_p10 = pneg %p4628_p6  ;;  %s4633_s20 = int_to_ptr.vmem [resolvable:$true] %s442_s20 }
  0xad   : > { %s4624_s24 = scalar_lea.hbm %s5329_s6, %s5272_s2  ;;  %s3990_s2 = scalar_lea.hbm %s5329_s6, 1024 }
  0xae   : > { %s3985_s3 = scalar_lea.hbm %s4624_s24, 512  ;;  %p3991_p4 = scmp.lt.u32.totalorder %s4624_s24, %s5329_s6 }
  0xaf   : > { %p3986_p9 = scmp.ne.s32.totalorder %s4624_s24, %s3985_s3  ;;  %p3992_p3 = scmp.lt.u32.totalorder %s3990_s2, %s3985_s3 }
  0xb0   : > { %p3994_p0 = scmp.lt.u32.totalorder %s3985_s3, %s4624_s24 }
  0xb1   : > { %p3988_p11 = pnand %p5280_p10, %p3986_p9  ;;  %p3993_p13 = por %p3992_p3, %p3991_p4 }
  0xb3   : > { %p3989_p12 = pneg %p3988_p11  ;;  %p3995_p2 = por %p3994_p0, %p3993_p13 }
  0xb5   : > { %p3996_p1 = pnand %p3995_p2, %p3989_p12 }
  0xb7   : > { %3999 = shalt.err (!%p3996_p1)
}
  0xb8   : > { %s4000_s10 = scalar_lea.vmem %s4633_s20, 512  ;;  %s4302_s1 = smov [#allocation12]  }
  0xb9   : > { %p4001_p9 = scmp.ne.s32.totalorder %s4633_s20, %s4000_s10  ;;  %s4005_s12 = sshll.u32 %s4302_s1, 4  ;;  %s4006_s12 = int_to_ptr.vmem [resolvable:$false] %s4005_s12 }
  0xba   : > { %s4007_s5 = scalar_lea.vmem %s4006_s12, 1024  ;;  %p4008_p5 = scmp.lt.s32.totalorder %s4633_s20, %s4006_s12 }
  0xbb   : > { %p4003_p11 = pnand %p4001_p9, %p5280_p10  ;;  %p4009_p4 = scmp.lt.s32.totalorder %s4007_s5, %s4000_s10 }
  0xbd   : > { %p4004_p8 = pneg %p4003_p11  ;;  %p4010_p3 = por %p4009_p4, %p4008_p5 }
  0xbf   : > { %p4011_p13 = pnand %p4010_p3, %p4004_p8 }
  0xc1   : > { %4014 = shalt.err (!%p4011_p13)
}
  0xc2   : > { %s5331_s2 = smov 8   ;;  %s5332_s23 = smov 128  }
  0xc3   : > { %3709 = dma.hbm_to_vmem [thread:$0]  (!%p4628_p6), %s4624_s24, 512, %s4633_s20, %s4635_s4, %s5332_s23, %s5332_s23, %s5331_s2  }
  0xc4   : > { %s5333_s1 = sld [smem:[#allocation42_spill]] }
  0xca   : > { %s338_s6 = sshll.u32 %s5333_s1, 4  ;;  %s339_s6 = int_to_ptr.vmem [resolvable:$true] %s338_s6 }
  0xcb   : > { %s4015_s12 = scalar_lea.vmem %s339_s6, 128  ;;  %p4023_p2 = scmp.lt.s32.totalorder %s339_s6, %s339_s6 }
  0xcc   : > { %p4016_p1 = scmp.ne.s32.totalorder %s339_s6, %s4015_s12  ;;  %p4024_p12 = scmp.lt.s32.totalorder %s4015_s12, %s4015_s12 }
  0xce   : > { %p4018_p5 = pnand %p4016_p1, %p4468_p7  ;;  %p4025_p0 = por %p4024_p12, %p4023_p2 }
  0xd0   : > { %p4019_p8 = pneg %p4018_p5 }
  0xd2   : > { %p4026_p9 = pnand %p4025_p0, %p4019_p8 }
  0xd4   : > { %4029 = shalt.err (!%p4026_p9)
}
  0xd5   : > { %s4303_s10 = smov [#allocation2]   ;;  %p5334_p11 = scmp.ne.s32.totalorder %s5312_s15, 0 }
  0xd6   : > { %s4304_s24 = smov [#allocation14]   ;;  %s5335_s14 = sld [smem:[#allocation50_spill]] }
  0xd7   : > { %3687 = dma.vmem_to_smem (!%p5334_p11), %s339_s6, 128, %s4303_s10, [#allocation5]  }
  0xd8   : > { %s403_s20 = sshll.u32 %s4304_s24, 4  ;;  %s404_s20 = int_to_ptr.vmem [resolvable:$true] %s403_s20 }
  0xdc   : > { %s4030_s1 = scalar_lea.hbm %s5335_s14, 768 }
  0xdd   : > { %p4031_p4 = scmp.ne.s32.totalorder %s5335_s14, %s4030_s1  ;;  %p4037_p1 = scmp.lt.u32.totalorder %s4030_s1, %s5335_s14 }
  0xdf   : > { %p4033_p3 = pnand %p4031_p4, %p4468_p7 }
  0xe1   : > { %p4034_p13 = pneg %p4033_p3 }
  0xe3   : > { %p4039_p5 = pnand %p4037_p1, %p4034_p13 }
  0xe5   : > { %4042 = shalt.err (!%p4039_p5)
}
  0xe6   : > { %s4043_s6 = scalar_lea.vmem %s404_s20, 768  ;;  %p4051_p0 = scmp.lt.s32.totalorder %s404_s20, %s404_s20 }
  0xe7   : > { %p4044_p8 = scmp.ne.s32.totalorder %s404_s20, %s4043_s6  ;;  %p4052_p9 = scmp.lt.s32.totalorder %s4043_s6, %s4043_s6 }
  0xe9   : > { %p4046_p2 = pnand %p4044_p8, %p4468_p7  ;;  %p4053_p10 = por %p4052_p9, %p4051_p0 }
  0xeb   : > { %p4047_p12 = pneg %p4046_p2 }
  0xed   : > { %p4054_p6 = pnand %p4053_p10, %p4047_p12 }
  0xef   : > { %4057 = shalt.err (!%p4054_p6)
}
  0xf0   : > { %s4305_s25 = smov 64   ;;  %s4306_s9 = smov 4  }
  0xf1   : > { %3702 = dma.hbm_to_vmem [thread:$0]  (!%p5334_p11), %s5335_s14, 768, %s404_s20, [#allocation8], %s4305_s25, %s4305_s25, %s4306_s9  }
  0xf2   : > { %s4307_s24 = smov [#allocation15]   ;;  %s5336_s3 = sshll.u32 %s4290_s26, 9 }
  0xf3   : > { %s416_s5 = sshll.u32 %s4307_s24, 4  ;;  %s5337_s6 = sld [smem:[#allocation49_spill]]  ;;  %s417_s5 = int_to_ptr.vmem [resolvable:$true] %s416_s5 }
  0xf4   : > { %s5338_s11 = sld [smem:[#allocation51_spill]] }
  0xf9   : > { %s4696_s22 = scalar_lea.hbm %s5337_s6, %s5336_s3 }
  0xfa   : > { %s4058_s17 = scalar_lea.hbm %s5338_s11, 768 }
  0xfb   : > { %p4059_p6 = scmp.ne.s32.totalorder %s5338_s11, %s4058_s17  ;;  %p4065_p3 = scmp.lt.u32.totalorder %s4058_s17, %s5338_s11 }
  0xfd   : > { %p4061_p10 = pnand %p4059_p6, %p4468_p7 }
  0xff   : > { %p4062_p4 = pneg %p4061_p10 }
 0x101   : > { %p4067_p13 = pnand %p4065_p3, %p4062_p4 }
 0x103   : > { %4070 = shalt.err (!%p4067_p13)
}
 0x104   : > { %s4071_s10 = scalar_lea.vmem %s417_s5, 768  ;;  %p4079_p2 = scmp.lt.s32.totalorder %s417_s5, %s417_s5 }
 0x105   : > { %p4072_p1 = scmp.ne.s32.totalorder %s417_s5, %s4071_s10  ;;  %p4080_p12 = scmp.lt.s32.totalorder %s4071_s10, %s4071_s10 }
 0x107   : > { %p4074_p5 = pnand %p4072_p1, %p4468_p7  ;;  %p4081_p0 = por %p4080_p12, %p4079_p2 }
 0x109   : > { %p4075_p8 = pneg %p4074_p5 }
 0x10b   : > { %p4082_p9 = pnand %p4081_p0, %p4075_p8 }
 0x10d   : > { %4085 = shalt.err (!%p4082_p9)
}
 0x10e   : > { %3705 = dma.hbm_to_vmem [thread:$0]  (!%p5334_p11), %s5338_s11, 768, %s417_s5, [#allocation11], %s4305_s25, %s4305_s25, %s4306_s9  }
 0x10f   : > { %s456_s17 = scalar_lea.vmem [#allocation13], %s4617_s8  ;;  %s4086_s28 = scalar_lea.hbm %s4696_s22, 512 }
 0x110   : > { %s464_s13 = sshll.u32 %s456_s17, 4  ;;  %p4087_p7 = scmp.ne.s32.totalorder %s4696_s22, %s4086_s28  ;;  %s4717_s13 = int_to_ptr.vmem [resolvable:$true] %s464_s13 }
 0x111   : > { %p5339_p6 = scmp.ne.s32.totalorder %s5330_s7, 0  ;;  %s4091_s24 = scalar_lea.hbm %s5337_s6, 1024 }
 0x112   : > { %p4092_p13 = scmp.lt.u32.totalorder %s4696_s22, %s5337_s6  ;;  %p4093_p1 = scmp.lt.u32.totalorder %s4091_s24, %s4086_s28 }
 0x113   : > { %p5340_p10 = pneg %p5339_p6  ;;  %p4095_p5 = scmp.lt.u32.totalorder %s4086_s28, %s4696_s22 }
 0x114   : > { %p4094_p11 = por %p4093_p1, %p4092_p13 }
 0x115   : > { %p4089_p4 = pnand %p4087_p7, %p5340_p10 }
 0x116   : > { %p4096_p8 = por %p4095_p5, %p4094_p11 }
 0x117   : > { %p4090_p3 = pneg %p4089_p4 }
 0x119   : > { %p4097_p2 = pnand %p4096_p8, %p4090_p3 }
 0x11b   : > { %4100 = shalt.err (!%p4097_p2)
}
 0x11c   : > { %s4101_s8 = scalar_lea.vmem %s4717_s13, 512  ;;  %p5341_p0 = pmov %p5340_p10 }
 0x11d   : > { %p4102_p12 = scmp.ne.s32.totalorder %s4717_s13, %s4101_s8  ;;  %s4308_s25 = smov [#allocation13]  }
 0x11e   : > { %s4106_s9 = sshll.u32 %s4308_s25, 4  ;;  %s4107_s9 = int_to_ptr.vmem [resolvable:$false] %s4106_s9 }
 0x11f   : > { %p4104_p9 = pnand %p4102_p12, %p5341_p0  ;;  %s4108_s5 = scalar_lea.vmem %s4107_s9, 1024 }
 0x120   : > { %p4109_p10 = scmp.lt.s32.totalorder %s4717_s13, %s4107_s9  ;;  %p4110_p4 = scmp.lt.s32.totalorder %s4108_s5, %s4101_s8 }
 0x121   : > { %p4105_p7 = pneg %p4104_p9 }
 0x122   : > { %p4111_p13 = por %p4110_p4, %p4109_p10 }
 0x124   : > { %p4112_p1 = pnand %p4111_p13, %p4105_p7 }
 0x126   : > { %4115 = shalt.err (!%p4112_p1)
}
 0x127   : > { %3712 = dma.hbm_to_vmem [thread:$0]  (!%p5339_p6), %s4696_s22, 512, %s4717_s13, %s4635_s4, %s5332_s23, %s5332_s23, %s5331_s2  }
 0x128   : > { %s5342_s12 = sld [smem:[#allocation35_spill]] }
 0x12e   : > { %p5343_p3 = scmp.ne.s32.totalorder %s5342_s12, 0 }
 0x12f   : > { %p5344_p11 = scmp.eq.s32.totalorder (!%p5343_p3), %s4437_s30, 0 }
 0x130   : > { %476 = sbr.rel (%p5343_p3) target bundleno = 1362 (0x552), region = 60 }
 0x137   : > { %4217 = dma.done.wait (%p5344_p11), [#allocation5], 128   ;;  %p5345_p5 = pmov %p5344_p11 }
 0x139   : > { %4219 = vsyncadd (%p5345_p5), [#allocation5], 4294967168  ;;  %p5346_p8 = pmov %p5345_p5 }
 0x13a   : > { %p5347_p2 = pmov %p5345_p5 }
 0x13b   : > { %4221 = dma.done.wait (%p5346_p8), [#allocation3], 512  }
 0x13c   : > { %4223 = vsyncadd (%p5347_p2), [#allocation3], 4294966784  ;;  %p5348_p12 = pmov %p5347_p2 }
 0x13d   : > { %p5349_p6 = pmov %p5347_p2 }
 0x13e   : > { %4225 = dma.done.wait (%p5348_p12), [#allocation8], 768  }
 0x13f   : > { %4227 = vsyncadd (%p5349_p6), [#allocation8], 4294966528  ;;  %p5350_p0 = pmov %p5347_p2 }
 0x141   : > { %4229 = dma.done.wait (%p5350_p0), [#allocation11], 256   ;;  %p5351_p9 = pmov %p5350_p0 }
 0x142   : > { %s498_s4 = sand.u32 1, %s4437_s30   ;;  %s500_s22 = sand.u32 1, %s4270_s21  }
 0x143   : > { %4231 = vsyncadd (%p5351_p9), [#allocation11], 4294967040  ;;  %s3159_s7 = sshll.u32 %s500_s22, 5  ;;  %s499_s2 = scalar_lea.sflag [#allocation3], %s498_s4 }
 0x144   : > { %s4766_s23 = scalar_lea.vmem [#allocation12], %s3159_s7  ;;  %p5352_p7 = scmp.ne.s32.totalorder %s5321_s16, 0 }
 0x146   : > { %4233 = dma.done.wait (%p5352_p7), %s499_s2, 1024  }
 0x147   : > { %4235 = vsyncadd (%p5352_p7), %s499_s2, 4294966272  ;;  %s4772_s20 = scalar_lea.vmem [#allocation13], %s3159_s7  ;;  %p5353_p10 = pmov %p5350_p0 }
 0x148   : > { %p5354_p4 = pmov %p5350_p0 }
 0x149   : > { %4237 = dma.done.wait (%p5353_p10), [#allocation8], 768  }
 0x14a   : > { %4239 = vsyncadd (%p5354_p4), [#allocation8], 4294966528  ;;  %p5355_p13 = pmov %p5350_p0 }
 0x14b   : > { %p5356_p1 = pmov %p5350_p0 }
 0x14c   : > { %4241 = dma.done.wait (%p5355_p13), [#allocation11], 768  }
 0x14d   : > { %4243 = vsyncadd (%p5356_p1), [#allocation11], 4294966528 }
 0x14e   : > { %524 = sfence }
 0x14f   : > { %s5357_s29 = sld [smem:[#allocation31_spill]]  ;;  %v4309_v0 = vmov 0.0   ;;  %v578_v1 = vld [vmem:[#allocation6] sm:$0xff]  ;;  %v579_v2 = vld [vmem:[#allocation6 + $0x8] sm:$0xff]  ;;  %v584_v3 = vld [vmem:[#allocation6 + $0x10] sm:$0xff]  ;;  %vm4310_vm0 = vmmov 0  }
 0x150   : > { %3328 = vmatprep.subr.bf16.mxu0 %v4309_v0  ;;  %3346 = vmatprep.subr.bf16.mxu1 %v4309_v0  ;;  %v591_v4 = vld [vmem:[#allocation7] sm:$0xff]  ;;  %v585_v5 = vld [vmem:[#allocation6 + $0x18] sm:$0xff]  ;;  %v592_v6 = vld [vmem:[#allocation7 + $0x8] sm:$0xff]  ;;  %v4311_v46 = vmov 683565275   ;;  %s5358_s13 = sld [smem:[#allocation45_spill]] }
 0x151   : > { %v596_v7 = vld [vmem:[#allocation7 + $0x10] sm:$0xff]  ;;  %v597_v9 = vld [vmem:[#allocation7 + $0x18] sm:$0xff]  ;;  %3330 = vmatprep.mubr.msk.bf16.mxu0 %vm4310_vm0, %v4309_v0  ;;  %3348 = vmatprep.mubr.msk.bf16.mxu1 %vm4310_vm0, %v4309_v0  ;;  %v4312_v48 = vmov 2475754826   ;;  %v4313_v50 = vmov 2131351028  }
 0x152   : > { %v4314_v52 = vmov 2102212464   ;;  %v4315_v54 = vmov 920167782   ;;  %v4316_v62 = vmov 1326507024  }
 0x153   : > { %s5070_s0 = sand.u32 1, %s4258_s18   ;;  %s5359_s8 = sld [smem:[#allocation32_spill]] }
 0x154   : > { %s3163_s24 = sshll.u32 %s5070_s0, 5  ;;  %s5360_s2 = sld [smem:[#allocation52_spill]] }
 0x155   : > { %s3165_s10 = sshll.u32 %s5357_s29, 7  ;;  %s5073_s3 = scalar_lea.vmem [#allocation16], %s3163_s24 }
 0x156   : > { %s575_s16 = sld [smem:[#allocation2 + %s3165_s10]]  ;;  %s576_s19 = sadd.s32 1, %s3165_s10 }
 0x157   : > { %s577_s27 = sld [smem:[#allocation2 + %s576_s19]]  ;;  %s5079_s1 = scalar_lea.vmem [#allocation17], %s3163_s24 }
 0x158   : > { %s3242_s9 = sshll.u32 %s5357_s29, 3  ;;  %s2905_s12 = sshll.u32 %s5073_s3, 4  ;;  %s5126_s12 = int_to_ptr.vmem [resolvable:$true] %s2905_s12 }
 0x159   : > { %s3254_s25 = sshll.u32 %s5359_s8, 2  ;;  %s2924_s29 = sshll.u32 %s5079_s1, 4  ;;  %s5178_s29 = int_to_ptr.vmem [resolvable:$true] %s2924_s29 }
 0x15a   : > { %s5122_s5 = sadd.s32 %s3254_s25, %s3242_s9  ;;  %s2884_s10 = scalar_lea.sflag [#allocation4], %s5070_s0 }
 0x15b   : > { %s3243_s4 = sshll.u32 %s5122_s5, 7  ;;  %s4317_s19 = smov [#allocation16]  }
 0x15c   : > { %v580_v8 = vstv %s575_s16  ;;  %s4116_s16 = scalar_lea.vmem %s5126_s12, 512 }
 0x15d   : > { %v581_v10 = vmul.f32 %v580_v8, %v578_v1  ;;  %v582_v11 = vmul.f32 %v580_v8, %v579_v2  ;;  %v586_v12 = vstv %s577_s27  ;;  %v593_v13 = vmul.f32 %v591_v4, %v580_v8  ;;  %p4117_p3 = scmp.ne.s32.totalorder %s5126_s12, %s4116_s16  ;;  %s4120_s27 = sshll.u32 %s4317_s19, 4  ;;  %s4121_s27 = int_to_ptr.vmem [resolvable:$false] %s4120_s27 }
 0x15e   : > { %v587_v14 = vmul.f32 %v586_v12, %v584_v3  ;;  %v588_v15 = vmul.f32 %v586_v12, %v585_v5  ;;  %v594_v16 = vmul.f32 %v592_v6, %v580_v8  ;;  %v598_v17 = vmul.f32 %v596_v7, %v586_v12  ;;  %s4122_s30 = scalar_lea.vmem %s4121_s27, 1024  ;;  %p4123_p2 = scmp.lt.s32.totalorder %s5126_s12, %s4121_s27 }
 0x15f   : > { %v599_v18 = vmul.f32 %v597_v9, %v586_v12  ;;  %p4124_p12 = scmp.lt.s32.totalorder %s4122_s30, %s4116_s16 }
 0x160   : > { %v4785_v19 = vadd.f32 %v587_v14, %v581_v10  ;;  %v4787_v20 = vadd.f32 %v588_v15, %v582_v11  ;;  %v600_v21 = vadd.f32 %v598_v17, %v593_v13 }
 0x161   : > { %v601_v22 = vadd.f32 %v599_v18, %v594_v16  ;;  %p4125_p6 = por %p4124_p12, %p4123_p2 }
 0x162   : > { %v610_v23 = vmul.f32 4.3, %v600_v21 }
 0x163   : > { %v611_v24 = vmul.f32 4.3, %v601_v22 }
 0x164   : > { %v4789_v25 = vmul.f32 -0.00487, %v610_v23 }
 0x165   : > { %v4791_v26 = vmul.f32 -0.00487, %v611_v24 }
 0x166   : > { %v618_v27 = vand.u32 2147483647, %v4789_v25  ;;  %v621_v28 = vand.u32 2139095040, %v4789_v25  ;;  %vm620_vm15 = vcmp.lt.s32.totalorder %v4789_v25, 0 }
 0x167   : > { %v724_v30 = vand.u32 2139095040, %v4791_v26  ;;  %v721_v32 = vand.u32 2147483647, %v4791_v26 }
 0x168   : > { %v622_v29 = vshrl.u32 %v621_v28, 23  ;;  %v625_v31 = vand.u32 8388607, %v618_v27 }
 0x169   : > { %v725_v34 = vshrl.u32 %v724_v30, 23  ;;  %v4805_v38 = vand.u32 8388607, %v721_v32 }
 0x16a   : > { %v3166_v33 = vadd.s32 4294967169, %v622_v29  ;;  %v626_v37 = vor.u32 8388608, %v625_v31 }
 0x16b   : > { %v3170_v36 = vadd.s32 4294967169, %v725_v34  ;;  %v729_v44 = vor.u32 8388608, %v4805_v38 }
 0x16c   : > { %v628_v35 = vadd.s32 1, %v3166_v33  ;;  %v4807_v43 = vshll.u32 %v626_v37, 8 }
 0x16d   : > { %v731_v39 = vadd.s32 1, %v3170_v36 }
 0x16e   : > { %vm629_vm1 = vcmp.gt.s32.totalorder %v628_v35, 0 }
 0x16f   : > { %v630_v40 = vsel %vm629_vm1, %v628_v35, 0  ;;  %vm732_vm2 = vcmp.gt.s32.totalorder %v731_v39, 0  ;;  %vm619_vm1 = vcmp.le.f32.partialorder %v618_v27, 0.7853982 }
 0x170   : > { %v631_v41 = vshrl.u32 %v630_v40, 5  ;;  %v632_v42 = vand.u32 31, %v630_v40  ;;  %v733_v56 = vsel %vm732_vm2, %v731_v39, 0  ;;  %vm723_vm2 = vcmp.lt.s32.totalorder %v4791_v26, 0 }
 0x171   : > { %v734_v6 = vshrl.u32 %v733_v56, 5  ;;  %v735_v7 = vand.u32 31, %v733_v56 }
 0x172   : > { %v633_v45 = vsub.s32 32, %v632_v42  ;;  %v635_v47 = vshll.u32 %v4311_v46, %v632_v42  ;;  %v638_v49 = vshll.u32 %v4312_v48, %v632_v42  ;;  %v641_v51 = vshll.u32 %v4313_v50, %v632_v42 }
 0x173   : > { %v644_v53 = vshll.u32 %v4314_v52, %v632_v42  ;;  %v647_v55 = vshll.u32 %v4315_v54, %v632_v42  ;;  %vm650_vm3 = vcmp.lt.s32.totalorder %v631_v41, 1  ;;  %vm651_vm4 = vcmp.lt.s32.totalorder %v631_v41, 2 }
 0x174   : > { %v634_v57 = vshrl.u32 %v4311_v46, %v633_v45  ;;  %v636_v58 = vshrl.u32 %v4312_v48, %v633_v45  ;;  %v639_v59 = vshrl.u32 %v4313_v50, %v633_v45  ;;  %v642_v60 = vshrl.u32 %v4314_v52, %v633_v45 }
 0x175   : > { %v645_v61 = vshrl.u32 %v4315_v54, %v633_v45  ;;  %v648_v63 = vshrl.u32 %v4316_v62, %v633_v45  ;;  %vm652_vm5 = vcmp.lt.s32.totalorder %v631_v41, 3  ;;  %vm653_vm6 = vcmp.lt.s32.totalorder %v631_v41, 4 }
 0x176   : > { %v637_v1 = vor.u32 %v636_v58, %v635_v47  ;;  %v640_v2 = vor.u32 %v639_v59, %v638_v49  ;;  %v643_v3 = vor.u32 %v642_v60, %v641_v51  ;;  %v736_v15 = vsub.s32 32, %v735_v7 }
 0x177   : > { %v646_v4 = vor.u32 %v645_v61, %v644_v53  ;;  %v649_v5 = vor.u32 %v648_v63, %v647_v55  ;;  %v738_v21 = vshll.u32 %v4311_v46, %v735_v7  ;;  %v741_v35 = vshll.u32 %v4312_v48, %v735_v7 }
 0x178   : > { %v654_v8 = vsel %vm650_vm3, %v634_v57, %v637_v1  ;;  %v655_v9 = vsel %vm653_vm6, %v643_v3, 2102212464  ;;  %v658_v10 = vsel %vm650_vm3, %v637_v1, %v640_v2  ;;  %v662_v11 = vsel %vm650_vm3, %v640_v2, %v643_v3 }
 0x179   : > { %v656_v12 = vsel %vm652_vm5, %v640_v2, %v655_v9  ;;  %v659_v13 = vsel %vm653_vm6, %v646_v4, 920167782  ;;  %v663_v14 = vsel %vm653_vm6, %v649_v5, 1326507024  ;;  %v737_v28 = vshrl.u32 %v4311_v46, %v736_v15 }
 0x17a   : > { %v657_v16 = vsel %vm651_vm4, %v654_v8, %v656_v12  ;;  %v660_v17 = vsel %vm652_vm5, %v643_v3, %v659_v13  ;;  %v664_v18 = vsel %vm652_vm5, %v646_v4, %v663_v14  ;;  %v739_v34 = vshrl.u32 %v4312_v48, %v736_v15 }
 0x17b   : > { %v661_v22 = vsel %vm651_vm4, %v658_v10, %v660_v17  ;;  %v665_v23 = vsel %vm651_vm4, %v662_v11, %v664_v18  ;;  %v673_v24 = vmul.u32 %v4807_v43, %v657_v16  ;;  %v742_v36 = vshrl.u32 %v4313_v50, %v736_v15 }
 0x17c   : > { %v4821_v29 = vmul.u32.u64.low %v4807_v43, %v665_v23  ;;  %v4822_v30 = vmul.u32.u64.high %v4807_v43, %v665_v23, %v4821_v29  ;;  %v4825_v31 = vmul.u32.u64.low %v4807_v43, %v661_v22  ;;  %v4826_v33 = vmul.u32.u64.high %v4807_v43, %v661_v22, %v4825_v31 }
 0x17d   : > { %v744_v37 = vshll.u32 %v4313_v50, %v735_v7  ;;  %v745_v39 = vshrl.u32 %v4314_v52, %v736_v15  ;;  %v747_v40 = vshll.u32 %v4314_v52, %v735_v7  ;;  %v748_v42 = vshrl.u32 %v4315_v54, %v736_v15 }
 0x17e   : > { %v750_v41 = vshll.u32 %v4315_v54, %v735_v7  ;;  %v740_v45 = vor.u32 %v739_v34, %v738_v21  ;;  %v743_v47 = vor.u32 %v742_v36, %v741_v35  ;;  %v751_v49 = vshrl.u32 %v4316_v62, %v736_v15 }
 0x17f   : > { %vm753_vm7 = vcmp.lt.s32.totalorder %v734_v6, 1  ;;  %vm675_vm8 = vc.u32 %v4822_v30, %v4825_v31  ;;  %v676_v46 = vadd.s32 1, %v4826_v33  ;;  %v746_v51 = vor.u32 %v745_v39, %v744_v37 }
 0x180   : > { %v769_v43 = vshll.u32 %v729_v44, 8  ;;  %v749_v53 = vor.u32 %v748_v42, %v747_v40  ;;  %v752_v48 = vor.u32 %v751_v49, %v750_v41  ;;  %vm754_vm9 = vcmp.lt.s32.totalorder %v734_v6, 2  ;;  %v602_v41 = vld [vmem:[%s5358_s13] sm:$0xff] }
 0x181   : > { %vm755_vm10 = vcmp.lt.s32.totalorder %v734_v6, 3  ;;  %v677_v50 = vsel %vm675_vm8, %v676_v46, %v4826_v33  ;;  %vm756_vm11 = vcmp.lt.s32.totalorder %v734_v6, 4  ;;  %v757_v52 = vsel %vm753_vm7, %v737_v28, %v740_v45 }
 0x182   : > { %v761_v54 = vsel %vm753_vm7, %v740_v45, %v743_v47  ;;  %v678_v55 = vadd.s32 %v677_v50, %v673_v24  ;;  %v758_v56 = vsel %vm756_vm11, %v746_v51, 2102212464  ;;  %v762_v57 = vsel %vm756_vm11, %v749_v53, 920167782 }
 0x183   : > { %v765_v58 = vsel %vm753_vm7, %v743_v47, %v746_v51  ;;  %v759_v59 = vsel %vm755_vm10, %v743_v47, %v758_v56  ;;  %v763_v60 = vsel %vm755_vm10, %v746_v51, %v762_v57  ;;  %v766_v38 = vsel %vm756_vm11, %v752_v48, 1326507024 }
 0x184   : > { %v679_v44 = vadd.s32 536870912, %v678_v55  ;;  %v764_v61 = vsel %vm754_vm9, %v761_v54, %v763_v60  ;;  %v767_v62 = vsel %vm755_vm10, %v749_v53, %v766_v38  ;;  %v760_v63 = vsel %vm754_vm9, %v757_v52, %v759_v59  ;;  %v603_v60 = vld [vmem:[%s5358_s13 + $0x8] sm:$0xff] }
 0x185   : > { %v768_v1 = vsel %vm754_vm9, %v765_v58, %v767_v62  ;;  %v4839_v2 = vmul.u32.u64.low %v769_v43, %v764_v61  ;;  %v4840_v3 = vmul.u32.u64.high %v769_v43, %v764_v61, %v4839_v2  ;;  %v776_v9 = vmul.u32 %v769_v43, %v760_v63 }
 0x186   : > { %v680_v4 = vshrl.u32 %v679_v44, 30  ;;  %v4842_v5 = vmul.u32.u64.low %v769_v43, %v768_v1  ;;  %v4843_v7 = vmul.u32.u64.high %v769_v43, %v768_v1, %v4842_v5  ;;  %v674_v22 = vadd.s32 %v4825_v31, %v4822_v30 }
 0x187   : > { %v779_v10 = vadd.s32 1, %v4840_v3  ;;  %v604_v39 = vmul.f32 4.3, %v4785_v19  ;;  %v605_v57 = vmul.f32 4.3, %v4787_v20  ;;  %vm710_vm10 = vweird.f32 %v4789_v25 }
 0x188   : > { %v681_v8 = vshll.u32 %v680_v4, 30  ;;  %vm778_vm12 = vc.u32 %v4843_v7, %v4839_v2  ;;  %v704_v51 = vsub.s32 4, %v680_v4  ;;  %v777_v43 = vadd.s32 %v4839_v2, %v4843_v7 }
 0x189   : > { %v780_v12 = vsel %vm778_vm12, %v779_v10, %v4840_v3  ;;  %v606_v49 = vadd.f32 %v604_v39, %v602_v41  ;;  %v607_v2 = vadd.f32 %v605_v57, %v603_v60  ;;  %vm722_vm3 = vcmp.le.f32.partialorder %v721_v32, 0.7853982 }
 0x18a   : > { %v682_v11 = vsub.s32 %v678_v55, %v681_v8  ;;  %v781_v14 = vadd.s32 %v780_v12, %v776_v9  ;;  %v705_v56 = vsel %vm620_vm15, %v704_v51, %v680_v4 }
 0x18b   : > { %v608_v54 = vmul.f32 -0.00487, %v606_v49  ;;  %v707_v61 = vsel %vm619_vm1, 0, %v705_v56  ;;  %v609_v7 = vmul.f32 -0.00487, %v607_v2 }
 0x18c   : > { %v684_v13 = vsub.s32 0, %v682_v11  ;;  %v782_v15 = vadd.s32 536870912, %v781_v14  ;;  %v919_v4 = vadd.s32 3, %v707_v61  ;;  %v711_v9 = vand.u32 3, %v707_v61 }
 0x18d   : > { %v614_v1 = vmul.f32 1.442695, %v608_v54 }
 0x18e   : > { %v3167_v6 = vmin.u32 %v684_v13, %v682_v11  ;;  %v4848_v17 = vshrl.u32 %v782_v15, 30  ;;  %v920_v10 = vand.u32 3, %v919_v4  ;;  %v616_v13 = vmul.f32 1.442695, %v609_v7 }
 0x18f   : > { %vm716_vm4 = vcmp.eq.s32.totalorder %v711_v9, 2  ;;  %vm713_vm6 = vcmp.eq.s32.totalorder %v711_v9, 0  ;;  %vm712_vm8 = vcmp.lt.s32.totalorder %v711_v9, 2 }
 0x190   : > { %v686_v16 = vclz %v3167_v6  ;;  %v784_v21 = vshll.u32 %v4848_v17, 30  ;;  %v807_v5 = vsub.s32 4, %v4848_v17  ;;  %vm925_vm5 = vcmp.eq.s32.totalorder %v920_v10, 2 }
 0x191   : > { %vm922_vm7 = vcmp.eq.s32.totalorder %v920_v10, 0  ;;  %vm921_vm9 = vcmp.lt.s32.totalorder %v920_v10, 2 }
 0x192   : > { %v3168_v18 = vadd.s32 4294967294, %v686_v16  ;;  %v785_v24 = vsub.s32 %v781_v14, %v784_v21  ;;  %v808_v12 = vsel %vm723_vm2, %v807_v5, %v4848_v17 }
 0x193   : > { %v810_v16 = vsel %vm722_vm3, 0, %v808_v12 }
 0x194   : > { %vm3169_vm13 = vcmp.lt.s32.totalorder %v3168_v18, 0  ;;  %v787_v34 = vsub.s32 0, %v785_v24 }
 0x195   : > { %v689_v23 = vsel %vm3169_vm13, 0, %v3168_v18 }
 0x196   : > { %v690_v28 = vsub.s32 32, %v689_v23  ;;  %v691_v29 = vshll.u32 %v682_v11, %v689_v23  ;;  %v694_v33 = vsub.s32 4294967266, %v689_v23  ;;  %v3171_v37 = vmin.u32 %v787_v34, %v785_v24 }
 0x197   : > { %v1023_v23 = vadd.s32 3, %v810_v16 }
 0x198   : > { %v692_v35 = vshrl.u32 %v674_v22, %v690_v28  ;;  %v695_v36 = vadd.s32 127, %v694_v33  ;;  %v789_v45 = vclz %v3171_v37  ;;  %v814_v37 = vand.u32 3, %v810_v16 }
 0x19a   : > { %v693_v40 = vor.u32 %v692_v35, %v691_v29  ;;  %v696_v42 = vshll.u32 %v695_v36, 23  ;;  %v3172_v47 = vadd.s32 4294967294, %v789_v45  ;;  %vm819_vm11 = vcmp.eq.s32.totalorder %v814_v37, 2 }
 0x19b   : > { %vm815_vm13 = vcmp.lt.s32.totalorder %v814_v37, 2 }
 0x19c   : > { %v697_v30 = vor.u32 4788187, %v696_v42  ;;  %v700_v31 = vcvt.s32.f32 %v693_v40  ;;  %vm3173_vm14 = vcmp.lt.s32.totalorder %v3172_v47, 0  ;;  %v1024_v40 = vand.u32 3, %v1023_v23 }
 0x19d   : > { %v792_v48 = vsel %vm3173_vm14, 0, %v3172_v47  ;;  %vm816_vm14 = vcmp.eq.s32.totalorder %v814_v37, 0  ;;  %v1117_v37 = vld [vmem:[%s4772_s20 + $0x8] sm:$0xff] }
 0x19e   : > { %v698_v46 = vand.u32 2147483647, %v697_v30  ;;  %v793_v19 = vsub.s32 32, %v792_v48  ;;  %v794_v50 = vshll.u32 %v785_v24, %v792_v48  ;;  %v797_v52 = vsub.s32 4294967266, %v792_v48 }
 0x19f   : > { %vm1029_vm12 = vcmp.eq.s32.totalorder %v1024_v40, 2 }
 0x1a0   : > { %v701_v53 = vmul.f32 %v700_v31, %v698_v46  ;;  %v795_v58 = vshrl.u32 %v777_v43, %v793_v19  ;;  %v798_v59 = vadd.s32 127, %v797_v52 }
 0x1a2   : > { %v702_v55 = vxor.u32 2147483648, %v701_v53  ;;  %v796_v62 = vor.u32 %v795_v58, %v794_v50  ;;  %v799_v63 = vshll.u32 %v798_v59, 23  ;;  %v1036_v58 = vld [vmem:[#allocation9] sm:$0xff] }
 0x1a4   : > { %v703_v38 = vsel %vm620_vm15, %v702_v55, %v701_v53  ;;  %v800_v27 = vor.u32 4788187, %v799_v63  ;;  %v803_v3 = vcvt.s32.f32 %v796_v62  ;;  %vm1026_vm15 = vcmp.eq.s32.totalorder %v1024_v40, 0 }
 0x1a5   : > { %v706_v44 = vsel %vm619_vm1, %v4789_v25, %v703_v38  ;;  %vm1025_vm1 = vcmp.lt.s32.totalorder %v1024_v40, 2 }
 0x1a6   : > { %3857 = vcosq.f32 %v706_v44  ;;  %v801_v20 = vand.u32 2147483647, %v800_v27 }
 0x1a7   : > { %3859 = vsinq.f32 %v706_v44 }
 0x1a8   : > { %3861 = vpow2.f32 %v614_v1  ;;  %v804_v8 = vmul.f32 %v803_v3, %v801_v20  ;;  %v1037_v3 = vld [vmem:[#allocation9 + $0x8] sm:$0xff] }
 0x1aa   : > { %v805_v11 = vxor.u32 2147483648, %v804_v8 }
 0x1ac   : > { %v806_v14 = vsel %vm723_vm2, %v805_v11, %v804_v8  ;;  %vm813_vm2 = vweird.f32 %v4791_v26 }
 0x1ad   : > { %v809_v15 = vsel %vm722_vm3, %v4791_v26, %v806_v14  ;;  %vm1141_vm3 = vcmask 130048  }
 0x1ae   : > { %3863 = vcosq.f32 %v809_v15 }
 0x1af   : > { %3865 = vsinq.f32 %v809_v15 }
 0x1b0   : > { %v3858_v6 = vpop.eup %3857  ;;  %3867 = vpow2.f32 %v616_v13 }
 0x1b1   : > { %v3860_v18 = vpop.eup %3859  ;;  %v717_v21 = vxor.u32 2147483648, %v3858_v6 }
 0x1b2   : > { %v714_v22 = vxor.u32 2147483648, %v3860_v18  ;;  %v3862_v24 = vpop.eup %3861 }
 0x1b3   : > { %v718_v32 = vsel %vm716_vm4, %v717_v21, %v3860_v18  ;;  %v927_v17 = vsel %vm925_vm5, %v717_v21, %v3860_v18 }
 0x1b4   : > { %v715_v28 = vsel %vm713_vm6, %v3858_v6, %v714_v22  ;;  %v924_v29 = vsel %vm922_vm7, %v3858_v6, %v714_v22 }
 0x1b5   : > { %v719_v33 = vsel %vm712_vm8, %v715_v28, %v718_v32  ;;  %v928_v34 = vsel %vm921_vm9, %v924_v29, %v927_v17  ;;  %v1068_v32 = vld [vmem:[#allocation10] sm:$0xff]  ;;  %v1114_v29 = vld [vmem:[%s4766_s23] sm:$0xff] }
 0x1b6   : > { %v720_v35 = vsel %vm710_vm10, nan, %v719_v33  ;;  %v929_v36 = vsel %vm710_vm10, nan, %v928_v34  ;;  %v1116_v33 = vld [vmem:[%s4772_s20] sm:$0xff] }
 0x1b7   : > { %v824_v39 = vmul.f32 %v3862_v24, %v720_v35  ;;  %v1034_v42 = vmul.f32 %v3862_v24, %v929_v36  ;;  %v1069_v35 = vld [vmem:[#allocation10 + $0x8] sm:$0xff]  ;;  %v1115_v36 = vld [vmem:[%s4766_s23 + $0x8] sm:$0xff] }
 0x1b8   : > { %v3864_v30 = vpop.eup %3863 }
 0x1b9   : > { %v1042_v41 = vsub.f32 0.0, %v1034_v42  ;;  %v1046_v45 = vmul.f32 0.9848077, %v824_v39  ;;  %v3866_v47 = vpop.eup %3865  ;;  %v820_v49 = vxor.u32 2147483648, %v3864_v30  ;;  %v1038_v54 = vsub.f32 1.0, %v824_v39 }
 0x1ba   : > { %v817_v46 = vxor.u32 2147483648, %v3866_v47  ;;  %v3868_v19 = vpop.eup %3867 }
 0x1bb   : > { %v1048_v25 = vsub.f32 1.0, %v1046_v45  ;;  %v1050_v31 = vmul.f32 0.9848077, %v1042_v41  ;;  %v821_v53 = vsel %vm819_vm11, %v820_v49, %v3866_v47  ;;  %v1031_v48 = vsel %vm1029_vm12, %v820_v49, %v3866_v47 }
 0x1bc   : > { %v818_v50 = vsel %vm816_vm14, %v3864_v30, %v817_v46  ;;  %v1028_v52 = vsel %vm1026_vm15, %v3864_v30, %v817_v46  ;;  %v1040_v61 = vmul.f32 %v1038_v54, %v1036_v58  ;;  %v1044_v62 = vmul.f32 %v1042_v41, %v1036_v58 }
 0x1bd   : > { %v1052_v51 = vmul.f32 %v1048_v25, %v1048_v25  ;;  %v1054_v43 = vmul.f32 %v1050_v31, %v1050_v31  ;;  %v822_v56 = vsel %vm815_vm13, %v818_v50, %v821_v53  ;;  %v1032_v57 = vsel %vm1025_vm1, %v1028_v52, %v1031_v48 }
 0x1be   : > { %v823_v59 = vsel %vm813_vm2, nan, %v822_v56  ;;  %v1033_v60 = vsel %vm813_vm2, nan, %v1032_v57  ;;  %v1060_v4 = vmul.f32 %v1048_v25, %v1040_v61  ;;  %v1062_v20 = vmul.f32 %v1050_v31, %v1044_v62 }
 0x1bf   : > { %v1056_v55 = vadd.f32 %v1054_v43, %v1052_v51  ;;  %v825_v38 = vmul.f32 %v3868_v19, %v823_v59  ;;  %v1035_v44 = vmul.f32 %v3868_v19, %v1033_v60  ;;  %v1072_v10 = vmul.f32 %v1048_v25, %v1044_v62  ;;  %v4896_v62 = vld [vmem:[#allocation14 + $0x10] sm:$0xff]  }
 0x1c0   : > { %v1074_v11 = vmul.f32 %v1050_v31, %v1040_v61  ;;  %v1064_v13 = vadd.f32 %v1062_v20, %v1060_v4  ;;  %v4894_v61 = vld [vmem:[#allocation14] sm:$0xff]   ;;  %v4920_v20 = vld [vmem:[#allocation14 + $0x8] sm:$0xff]  }
 0x1c1   : > { %3869 = vrcp.f32 %v1056_v55  ;;  %v1043_v63 = vsub.f32 0.0, %v1035_v44  ;;  %v1047_v26 = vmul.f32 0.9848077, %v825_v38  ;;  %v1039_v1 = vsub.f32 1.0, %v825_v38 }
 0x1c2   : > { %v1076_v15 = vsub.f32 %v1072_v10, %v1074_v11  ;;  %v4951_v10 = vld [vmem:[#allocation15] sm:$0xff]   ;;  %v4955_v11 = vld [vmem:[#allocation15 + $0x10] sm:$0xff]  }
 0x1c3   : > { %v1049_v2 = vsub.f32 1.0, %v1047_v26  ;;  %v1051_v27 = vmul.f32 0.9848077, %v1043_v63  ;;  %v1041_v8 = vmul.f32 %v1039_v1, %v1037_v3  ;;  %v1045_v12 = vmul.f32 %v1043_v63, %v1037_v3 }
 0x1c5   : > { %v1053_v5 = vmul.f32 %v1049_v2, %v1049_v2  ;;  %v1055_v7 = vmul.f32 %v1051_v27, %v1051_v27  ;;  %v1061_v6 = vmul.f32 %v1049_v2, %v1041_v8  ;;  %v1063_v16 = vmul.f32 %v1051_v27, %v1045_v12 }
 0x1c6   : > { %v1073_v21 = vmul.f32 %v1049_v2, %v1045_v12  ;;  %v1075_v22 = vmul.f32 %v1051_v27, %v1041_v8  ;;  %v4933_v8 = vld [vmem:[#allocation14 + $0x20] sm:$0xff]  }
 0x1c7   : > { %v1057_v9 = vadd.f32 %v1055_v7, %v1053_v5  ;;  %v1065_v23 = vadd.f32 %v1063_v16, %v1061_v6  ;;  %v4922_v5 = vld [vmem:[#allocation14 + $0x18] sm:$0xff]  }
 0x1c8   : > { %v1077_v28 = vsub.f32 %v1073_v21, %v1075_v22 }
 0x1c9   : > { %3871 = vrcp.f32 %v1057_v9  ;;  %v4945_v9 = vld [vmem:[#allocation14 + $0x28] sm:$0xff]  }
 0x1cb   : > { %v3870_v14 = vpop.eup %3869 }
 0x1cc   : > { %v1066_v18 = vmul.f32 %v3870_v14, %v1064_v13  ;;  %v4874_v17 = vmul.f32 %v3870_v14, %v1076_v15 }
 0x1ce   : > { %v4876_v24 = vadd.f32 %v1068_v32, %v1066_v18  ;;  %v1120_v39 = vmul.f32 %v1116_v33, %v4874_v17  ;;  %v1126_v40 = vmul.f32 %v1114_v29, %v4874_v17 }
 0x1d0   : > { %v1118_v45 = vmul.f32 %v1114_v29, %v4876_v24  ;;  %v1124_v30 = vmul.f32 %v1116_v33, %v4876_v24 }
 0x1d2   : > { %v1122_v46 = vsub.f32 %v1118_v45, %v1120_v39  ;;  %v1128_v43 = vadd.f32 %v1126_v40, %v1124_v30  ;;  %v4971_v45 = vld [vmem:[#allocation15 + $0x20] sm:$0xff]  }
 0x1d3   : > { %v3872_v34 = vpop.eup %3871 }
 0x1d4   : > { %v1067_v42 = vmul.f32 %v3872_v34, %v1065_v23  ;;  %v4884_v41 = vmul.f32 %v3872_v34, %v1077_v28  ;;  %v1425_v63 = vadd.f32 %v1128_v43, %v1122_v46 }
 0x1d6   : > { %v4888_v25 = vadd.f32 %v1069_v35, %v1067_v42  ;;  %v1121_v31 = vmul.f32 %v1117_v37, %v4884_v41  ;;  %v1127_v47 = vmul.f32 %v1115_v36, %v4884_v41 }
 0x1d8   : > { %v1119_v49 = vmul.f32 %v1115_v36, %v4888_v25  ;;  %v1125_v51 = vmul.f32 %v1117_v37, %v4888_v25  ;;  %v4964_v36 = vld [vmem:[#allocation15 + $0x8] sm:$0xff]  }
 0x1da   : > { %v1123_v53 = vsub.f32 %v1119_v49, %v1121_v31  ;;  %v1129_v48 = vadd.f32 %v1127_v47, %v1125_v51 }
 0x1dc   : > { %v1130_v19 = vpack.c.bf16 %v1123_v53, %v1122_v46  ;;  %v1278_v50 = vpack.c.bf16 %v1129_v48, %v1128_v43  ;;  %v1426_v26 = vadd.f32 %v1129_v48, %v1123_v53 }
 0x1de   : > { %v1131_v52 = vunpack.c.l.bf16 %v1130_v19  ;;  %v1132_v54 = vunpack.c.h.bf16 %v1130_v19  ;;  %v1279_v55 = vunpack.c.l.bf16 %v1278_v50  ;;  %v1280_v56 = vunpack.c.h.bf16 %v1278_v50 }
 0x1df   : > { %v1427_v1 = vpack.c.bf16 %v1426_v26, %v1425_v63 }
 0x1e0   : > { %v1133_v57 = vsub.f32 %v1122_v46, %v1131_v52  ;;  %v1134_v58 = vsub.f32 %v1123_v53, %v1132_v54  ;;  %v1281_v59 = vsub.f32 %v1128_v43, %v1279_v55  ;;  %v1282_v60 = vsub.f32 %v1129_v48, %v1280_v56  ;;  %v3212_v56 = vld [vmem:[%s4766_s23 + $0x10] sm:$0xff] }
 0x1e1   : > { %v1428_v2 = vunpack.c.l.bf16 %v1427_v1  ;;  %v1429_v27 = vunpack.c.h.bf16 %v1427_v1 }
 0x1e2   : > { %v1135_v38 = vpack.c.bf16 %v1134_v58, %v1133_v57  ;;  %v1283_v44 = vpack.c.bf16 %v1282_v60, %v1281_v59  ;;  %v3213_v60 = vld [vmem:[%s4766_s23 + $0x18] sm:$0xff]  ;;  %s5361_s23 = sld [smem:[#allocation38_spill]] }
 0x1e3   : > { %v1430_v3 = vsub.f32 %v1425_v63, %v1428_v2  ;;  %v1431_v4 = vsub.f32 %v1426_v26, %v1429_v27  ;;  %v2045_v26 = vmul.f32 %v3212_v56, %v4876_v24 }
 0x1e4   : > { %3329 = vmatpush3.bf16.msra.mxu0 %v1135_v38  ;;  %3347 = vmatpush3.bf16.msra.mxu1 %v1283_v44  ;;  %v3214_v38 = vld [vmem:[%s4772_s20 + $0x10] sm:$0xff]  ;;  %v3215_v44 = vld [vmem:[%s4772_s20 + $0x18] sm:$0xff]  ;;  %s5133_s20 = scalar_lea.hbm %s5360_s2, %s3243_s4 }
 0x1e5   : > { %3334 = vmatprep.subr.bf16.mxu0 %v4309_v0  ;;  %3352 = vmatprep.subr.bf16.mxu1 %v4309_v0  ;;  %v1432_v7 = vpack.c.bf16 %v1431_v4, %v1430_v3  ;;  %v2047_v2 = vmul.f32 %v3214_v38, %v4874_v17  ;;  %v2048_v27 = vmul.f32 %v3215_v44, %v4884_v41 }
 0x1e6   : > { %v2051_v3 = vmul.f32 %v3214_v38, %v4876_v24  ;;  %v2052_v4 = vmul.f32 %v3215_v44, %v4888_v25 }
 0x1e7   : > { %3331 = vmatmul.mubr.msk.bf16.vlgmr.msra.gmra.mrb[0].mxu0 %vm1141_vm3, %v4894_v61  ;;  %3349 = vmatmul.mubr.msk.bf16.vlgmr.msra.gmra.mrb[0].mxu1 %vm1141_vm3, %v4896_v62 }
 0x1e8   : > { %3335 = vmatpush3.bf16.msra.mxu0 %v1130_v19  ;;  %3353 = vmatpush3.bf16.msra.mxu1 %v1278_v50  ;;  %p5362_p11 = scmp.ne.s32.totalorder %s5361_s23, 0 }
 0x1e9   : > { %3336 = vmatprep.mubr.msk.bf16.mxu0 %vm4310_vm0, %v4309_v0  ;;  %3354 = vmatprep.mubr.msk.bf16.mxu1 %vm4310_vm0, %v4309_v0 }
 0x1ea   : > { %3340 = vmatprep.subr.bf16.mxu0 %v4309_v0  ;;  %3358 = vmatprep.subr.bf16.mxu1 %v4309_v0  ;;  %p4118_p5 = pnand %p4117_p3, %p5362_p11 }
 0x1ec   : > { %p4119_p8 = pneg %p4118_p5 }
 0x1ee   : > { %p4126_p0 = pnand %p4125_p6, %p4119_p8 }
 0x1f3   : > { %3337 = vmatmul.mubr.msk.bf16.vlgmr.msra.gmra.mrb[0].mxu0 %vm1141_vm3, %v4894_v61  ;;  %3355 = vmatmul.mubr.msk.bf16.vlgmr.msra.gmra.mrb[0].mxu1 %vm1141_vm3, %v4896_v62 }
 0x1f4   : > { %3341 = vmatpush3.bf16.msra.mxu0 %v1130_v19  ;;  %3359 = vmatpush3.bf16.msra.mxu1 %v1278_v50 }
 0x1f5   : > { %3342 = vmatprep.mubr.msk.bf16.mxu0 %vm4310_vm0, %v4309_v0  ;;  %3360 = vmatprep.mubr.msk.bf16.mxu1 %vm4310_vm0, %v4309_v0 }
 0x1f6   : > { %3364 = vmatprep.subr.bf16.mxu0 %v4309_v0  ;;  %3382 = vmatprep.subr.bf16.mxu1 %v4309_v0 }
 0x1ff   : > { %3343 = vmatmul.mubr.msk.bf16.vlgmr.msra.gmra.mrb[0].mxu0 %vm1141_vm3, %v4920_v20  ;;  %3361 = vmatmul.mubr.msk.bf16.vlgmr.msra.gmra.mrb[0].mxu1 %vm1141_vm3, %v4922_v5 }
 0x200   : > { %3365 = vmatpush3.bf16.msra.mxu0 %v1432_v7  ;;  %3366 = vmatprep.mubr.msk.bf16.mxu0 %vm4310_vm0, %v4309_v0  ;;  %v2053_v7 = vmul.f32 %v3212_v56, %v4874_v17 }
 0x201   : > { %3370 = vmatprep.subr.bf16.mxu0 %v4309_v0  ;;  %3384 = vmatprep.mubr.msk.bf16.mxu1 %vm4310_vm0, %v4309_v0 }
 0x202   : > { %3383 = vmatpush3.bf16.msra.mxu1 %v4951_v10 }
 0x203   : > { %3388 = vmatprep.subr.bf16.mxu1 %v4309_v0 }
 0x207   : > { %3367 = vmatmul.mubr.msk.bf16.vlgmr.msra.gmra.mrb[4].mxu0 %vm1141_vm3, %v4933_v8 }
 0x208   : > { %3371 = vmatpush3.bf16.msra.mxu0 %v1427_v1  ;;  %3372 = vmatprep.mubr.msk.bf16.mxu0 %vm4310_vm0, %v4309_v0 }
 0x209   : > { %3376 = vmatprep.subr.bf16.mxu0 %v4309_v0 }
 0x213   : > { %3373 = vmatmul.mubr.msk.bf16.vlgmr.msra.gmra.mrb[4].mxu0 %vm1141_vm3, %v4933_v8 }
 0x214   : > { %3377 = vmatpush3.bf16.msra.mxu0 %v1427_v1  ;;  %3378 = vmatprep.mubr.msk.bf16.mxu0 %vm4310_vm0, %v4309_v0  ;;  %v2046_v1 = vmul.f32 %v3213_v60, %v4888_v25 }
 0x215   : > { %3400 = vmatprep.subr.bf16.mxu0 %v4309_v0 }
 0x21f   : > { %3379 = vmatmul.mubr.msk.bf16.vlgmr.msra.gmra.mrb[4].mxu0 %vm1141_vm3, %v4945_v9 }
 0x220   : > { %3402 = vmatprep.mubr.msk.bf16.mxu0 %vm4310_vm0, %v4309_v0  ;;  %3401 = vmatpush3.bf16.msra.mxu0 %v4955_v11 }
 0x221   : > { %3406 = vmatprep.subr.bf16.mxu0 %v4309_v0 }
 0x2d2   : > { %v1269_v12 = vpop.f32.mrb[0].mxu0  ;;  %v1416_v13 = vpop.f32.mrb[0].mxu1 }
 0x2d3   : > { %v1574_v14 = vsub.f32 %v1269_v12, %v1416_v13  ;;  %v3344_v6 = vpop.f32.mrb[1].mxu0  ;;  %v3362_v15 = vpop.f32.mrb[1].mxu1 }
 0x2d4   : > { %v1272_v16 = vpop.f32.mrb[2].mxu0  ;;  %v1419_v18 = vpop.f32.mrb[2].mxu1  ;;  %v2055_v6 = vadd.f32 %v2053_v7, %v2051_v3 }
 0x2d5   : > { %v1575_v21 = vsub.f32 %v1272_v16, %v1419_v18  ;;  %v3345_v22 = vpop.f32.mrb[3].mxu0  ;;  %v3363_v32 = vpop.f32.mrb[3].mxu1 }
 0x2d7   : > { %v1580_v23 = vpack.c.bf16 %v1575_v21, %v1574_v14 }
 0x2d9   : > { %v1581_v28 = vunpack.c.l.bf16 %v1580_v23  ;;  %v1582_v29 = vunpack.c.h.bf16 %v1580_v23 }
 0x2db   : > { %v1583_v33 = vsub.f32 %v1574_v14, %v1581_v28  ;;  %v1584_v34 = vsub.f32 %v1575_v21, %v1582_v29 }
 0x2dd   : > { %v1585_v35 = vpack.c.bf16 %v1584_v34, %v1583_v33 }
 0x2df   : > { %3385 = vmatmul.mubr.msk.bf16.vlgmr.msra.gmra.mrb[4].mxu1 %vm1141_vm3, %v1585_v35 }
 0x2e0   : > { %3389 = vmatpush3.bf16.msra.mxu1 %v4951_v10  ;;  %3390 = vmatprep.mubr.msk.bf16.mxu1 %vm4310_vm0, %v4309_v0 }
 0x2e1   : > { %3394 = vmatprep.subr.bf16.mxu1 %v4309_v0 }
 0x2eb   : > { %3391 = vmatmul.mubr.msk.bf16.vlgmr.msra.gmra.mrb[4].mxu1 %vm1141_vm3, %v1580_v23 }
 0x2ec   : > { %3395 = vmatpush3.bf16.msra.mxu1 %v4964_v36  ;;  %3396 = vmatprep.mubr.msk.bf16.mxu1 %vm4310_vm0, %v4309_v0 }
 0x2ed   : > { %3418 = vmatprep.subr.bf16.mxu1 %v4309_v0 }
 0x2f2   : > { %v1565_v37 = vpop.f32.mrb[4].mxu0 }
 0x2f3   : > { %v1576_v39 = vsub.f32 %v1565_v37, %v1269_v12  ;;  %v3380_v40 = vpop.f32.mrb[5].mxu0  ;;  %v2054_v12 = vmul.f32 %v3213_v60, %v4884_v41 }
 0x2f4   : > { %v1568_v42 = vpop.f32.mrb[6].mxu0 }
 0x2f5   : > { %v1578_v30 = vsub.f32 %v1576_v39, %v1416_v13  ;;  %v1577_v31 = vsub.f32 %v1568_v42, %v1272_v16  ;;  %v3381_v47 = vpop.f32.mrb[7].mxu0  ;;  %v2049_v13 = vsub.f32 %v2045_v26, %v2047_v2  ;;  %v2056_v15 = vadd.f32 %v2054_v12, %v2052_v4  ;;  %v5000_v16 = vld [vmem:[#allocation15 + $0x18] sm:$0xff]  }
 0x2f7   : > { %v1878_v49 = vadd.f32 %v1578_v30, %v1574_v14  ;;  %v1579_v46 = vsub.f32 %v1577_v31, %v1419_v18  ;;  %3397 = vmatmul.mubr.msk.bf16.vlgmr.msra.gmra.mrb[4].mxu1 %vm1141_vm3, %v1580_v23  ;;  %v2050_v14 = vsub.f32 %v2046_v1, %v2048_v27  ;;  %v5002_v18 = vld [vmem:[#allocation15 + $0x28] sm:$0xff]   ;;  %v2319_v35 = vadd.f32 %v2055_v6, %v2049_v13 }
 0x2f8   : > { %3419 = vmatpush3.bf16.msra.mxu1 %v4971_v45  ;;  %3420 = vmatprep.mubr.msk.bf16.mxu1 %vm4310_vm0, %v4309_v0 }
 0x2f9   : > { %v1729_v51 = vpack.c.bf16 %v1579_v46, %v1578_v30  ;;  %v1879_v43 = vadd.f32 %v1579_v46, %v1575_v21  ;;  %3424 = vmatprep.subr.bf16.mxu1 %v4309_v0  ;;  %v2057_v24 = vpack.c.bf16 %v2050_v14, %v2049_v13  ;;  %v2188_v21 = vpack.c.bf16 %v2056_v15, %v2055_v6 }
 0x2fa   : > { %v2320_v37 = vadd.f32 %v2056_v15, %v2050_v14 }
 0x2fb   : > { %v1730_v53 = vunpack.c.l.bf16 %v1729_v51  ;;  %v1731_v48 = vunpack.c.h.bf16 %v1729_v51  ;;  %v1880_v19 = vpack.c.bf16 %v1879_v43, %v1878_v49  ;;  %v2058_v17 = vunpack.c.l.bf16 %v2057_v24 }
 0x2fc   : > { %v2059_v41 = vunpack.c.h.bf16 %v2057_v24  ;;  %v2189_v25 = vunpack.c.l.bf16 %v2188_v21  ;;  %v2190_v22 = vunpack.c.h.bf16 %v2188_v21  ;;  %v2321_v39 = vpack.c.bf16 %v2320_v37, %v2319_v35 }
 0x2fd   : > { %v1732_v50 = vsub.f32 %v1578_v30, %v1730_v53  ;;  %v1733_v52 = vsub.f32 %v1579_v46, %v1731_v48  ;;  %v1881_v54 = vunpack.c.l.bf16 %v1880_v19  ;;  %v1882_v55 = vunpack.c.h.bf16 %v1880_v19 }
 0x2fe   : > { %v2060_v32 = vsub.f32 %v2049_v13, %v2058_v17  ;;  %v2061_v23 = vsub.f32 %v2050_v14, %v2059_v41  ;;  %v2191_v28 = vsub.f32 %v2055_v6, %v2189_v25  ;;  %v2192_v29 = vsub.f32 %v2056_v15, %v2190_v22 }
 0x2ff   : > { %v1734_v57 = vpack.c.bf16 %v1733_v52, %v1732_v50  ;;  %v1883_v58 = vsub.f32 %v1878_v49, %v1881_v54  ;;  %v1884_v59 = vsub.f32 %v1879_v43, %v1882_v55  ;;  %v2322_v40 = vunpack.c.l.bf16 %v2321_v39 }
 0x300   : > { %v2062_v33 = vpack.c.bf16 %v2061_v23, %v2060_v32  ;;  %v2193_v34 = vpack.c.bf16 %v2192_v29, %v2191_v28  ;;  %v2323_v42 = vunpack.c.h.bf16 %v2321_v39 }
 0x301   : > { %v1885_v63 = vpack.c.bf16 %v1884_v59, %v1883_v58  ;;  %3403 = vmatmul.mubr.msk.bf16.vlgmr.msra.gmra.mrb[8].mxu0 %vm1141_vm3, %v1734_v57  ;;  %v2324_v30 = vsub.f32 %v2319_v35, %v2322_v40 }
 0x302   : > { %3407 = vmatpush3.bf16.msra.mxu0 %v4955_v11  ;;  %3408 = vmatprep.mubr.msk.bf16.mxu0 %vm4310_vm0, %v4309_v0  ;;  %v2325_v31 = vsub.f32 %v2320_v37, %v2323_v42 }
 0x303   : > { %3421 = vmatmul.mubr.msk.bf16.vlgmr.msra.gmra.mrb[8].mxu1 %vm1141_vm3, %v1885_v63  ;;  %3412 = vmatprep.subr.bf16.mxu0 %v4309_v0 }
 0x304   : > { %3425 = vmatpush3.bf16.msra.mxu1 %v4971_v45  ;;  %3426 = vmatprep.mubr.msk.bf16.mxu1 %vm4310_vm0, %v4309_v0 }
 0x305   : > { %3430 = vmatprep.subr.bf16.mxu1 %v4309_v0 }
 0x30d   : > { %3409 = vmatmul.mubr.msk.bf16.vlgmr.msra.gmra.mrb[8].mxu0 %vm1141_vm3, %v1729_v51 }
 0x30e   : > { %3413 = vmatpush3.bf16.msra.mxu0 %v5000_v16  ;;  %3414 = vmatprep.mubr.msk.bf16.mxu0 %vm4310_vm0, %v4309_v0 }
 0x30f   : > { %3427 = vmatmul.mubr.msk.bf16.vlgmr.msra.gmra.mrb[8].mxu1 %vm1141_vm3, %v1880_v19  ;;  %3436 = vmatprep.subr.bf16.mxu0 %v4309_v0 }
 0x310   : > { %3431 = vmatpush3.bf16.msra.mxu1 %v5002_v18  ;;  %3432 = vmatprep.mubr.msk.bf16.mxu1 %vm4310_vm0, %v4309_v0 }
 0x311   : > { %3454 = vmatprep.subr.bf16.mxu1 %v4309_v0 }
 0x319   : > { %3415 = vmatmul.mubr.msk.bf16.vlgmr.msra.gmra.mrb[8].mxu0 %vm1141_vm3, %v1729_v51 }
 0x31a   : > { %3437 = vmatpush3.bf16.msra.mxu0 %v2062_v33  ;;  %3438 = vmatprep.mubr.msk.bf16.mxu0 %vm4310_vm0, %v4309_v0 }
 0x31b   : > { %3433 = vmatmul.mubr.msk.bf16.vlgmr.msra.gmra.mrb[8].mxu1 %vm1141_vm3, %v1880_v19  ;;  %3442 = vmatprep.subr.bf16.mxu0 %v4309_v0 }
 0x31c   : > { %3455 = vmatpush3.bf16.msra.mxu1 %v2193_v34  ;;  %3456 = vmatprep.mubr.msk.bf16.mxu1 %vm4310_vm0, %v4309_v0 }
 0x31d   : > { %3460 = vmatprep.subr.bf16.mxu1 %v4309_v0 }
 0x321   : > { %3439 = vmatmul.mubr.msk.bf16.vlgmr.msra.gmra.mrb[12].mxu0 %vm1141_vm3, %v4894_v61 }
 0x322   : > { %3443 = vmatpush3.bf16.msra.mxu0 %v2057_v24  ;;  %3444 = vmatprep.mubr.msk.bf16.mxu0 %vm4310_vm0, %v4309_v0 }
 0x323   : > { %3457 = vmatmul.mubr.msk.bf16.vlgmr.msra.gmra.mrb[12].mxu1 %vm1141_vm3, %v4896_v62  ;;  %3448 = vmatprep.subr.bf16.mxu0 %v4309_v0 }
 0x324   : > { %3461 = vmatpush3.bf16.msra.mxu1 %v2188_v21  ;;  %3462 = vmatprep.mubr.msk.bf16.mxu1 %vm4310_vm0, %v4309_v0 }
 0x325   : > { %3466 = vmatprep.subr.bf16.mxu1 %v4309_v0 }
 0x32d   : > { %3445 = vmatmul.mubr.msk.bf16.vlgmr.msra.gmra.mrb[12].mxu0 %vm1141_vm3, %v4894_v61  ;;  %v2326_v61 = vpack.c.bf16 %v2325_v31, %v2324_v30 }
 0x32e   : > { %3449 = vmatpush3.bf16.msra.mxu0 %v2057_v24  ;;  %3450 = vmatprep.mubr.msk.bf16.mxu0 %vm4310_vm0, %v4309_v0 }
 0x32f   : > { %3463 = vmatmul.mubr.msk.bf16.vlgmr.msra.gmra.mrb[12].mxu1 %vm1141_vm3, %v4896_v62  ;;  %3472 = vmatprep.subr.bf16.mxu0 %v4309_v0 }
 0x330   : > { %3467 = vmatpush3.bf16.msra.mxu1 %v2188_v21  ;;  %3468 = vmatprep.mubr.msk.bf16.mxu1 %vm4310_vm0, %v4309_v0 }
 0x331   : > { %3490 = vmatprep.subr.bf16.mxu1 %v4309_v0 }
 0x339   : > { %3451 = vmatmul.mubr.msk.bf16.vlgmr.msra.gmra.mrb[12].mxu0 %vm1141_vm3, %v4920_v20 }
 0x33a   : > { %3473 = vmatpush3.bf16.msra.mxu0 %v2326_v61  ;;  %3474 = vmatprep.mubr.msk.bf16.mxu0 %vm4310_vm0, %v4309_v0 }
 0x33b   : > { %3469 = vmatmul.mubr.msk.bf16.vlgmr.msra.gmra.mrb[12].mxu1 %vm1141_vm3, %v4922_v5  ;;  %3478 = vmatprep.subr.bf16.mxu0 %v4309_v0 }
 0x33c   : > { %3491 = vmatpush3.bf16.msra.mxu1 %v4951_v10  ;;  %3492 = vmatprep.mubr.msk.bf16.mxu1 %vm4310_vm0, %v4309_v0 }
 0x33d   : > { %3496 = vmatprep.subr.bf16.mxu1 %v4309_v0 }
 0x341   : > { %3475 = vmatmul.mubr.msk.bf16.vlgmr.msra.gmra.mrb[16].mxu0 %vm1141_vm3, %v4933_v8 }
 0x342   : > { %3479 = vmatpush3.bf16.msra.mxu0 %v2321_v39  ;;  %3480 = vmatprep.mubr.msk.bf16.mxu0 %vm4310_vm0, %v4309_v0 }
 0x343   : > { %3484 = vmatprep.subr.bf16.mxu0 %v4309_v0 }
 0x34d   : > { %3481 = vmatmul.mubr.msk.bf16.vlgmr.msra.gmra.mrb[16].mxu0 %vm1141_vm3, %v4933_v8 }
 0x34e   : > { %3485 = vmatpush3.bf16.msra.mxu0 %v2321_v39  ;;  %3486 = vmatprep.mubr.msk.bf16.mxu0 %vm4310_vm0, %v4309_v0 }
 0x34f   : > { %3508 = vmatprep.subr.bf16.mxu0 %v4309_v0 }
 0x359   : > { %3487 = vmatmul.mubr.msk.bf16.vlgmr.msra.gmra.mrb[16].mxu0 %vm1141_vm3, %v4945_v9 }
 0x35a   : > { %3509 = vmatpush3.bf16.msra.mxu0 %v4955_v11  ;;  %3510 = vmatprep.mubr.msk.bf16.mxu0 %vm4310_vm0, %v4309_v0 }
 0x35b   : > { %3514 = vmatprep.subr.bf16.mxu0 %v4309_v0 }
 0x3ca   : > { %v1720_v62 = vpop.f32.mrb[4].mxu1 }
 0x3cb   : > { %v3398_v20 = vpop.f32.mrb[5].mxu1 }
 0x3cc   : > { %v1723_v5 = vpop.f32.mrb[6].mxu1 }
 0x3cd   : > { %v3399_v8 = vpop.f32.mrb[7].mxu1 }
 0x3ec   : > { %v1869_v47 = vpop.f32.mrb[8].mxu0 }
 0x3ed   : > { %v2029_v49 = vsub.f32 %v1720_v62, %v1869_v47  ;;  %v3416_v46 = vpop.f32.mrb[9].mxu0 }
 0x3ee   : > { %v1872_v51 = vpop.f32.mrb[10].mxu0  ;;  %v2020_v9 = vpop.f32.mrb[8].mxu1 }
 0x3ef   : > { %2035 = vst.msk [vmem:[%s5073_s3] sm:$0xff] %vm1141_vm3, %v2029_v49  ;;  %v2030_v43 = vsub.f32 %v1723_v5, %v1872_v51  ;;  %v2031_v53 = vsub.f32 %v2020_v9, %v1720_v62  ;;  %v3417_v48 = vpop.f32.mrb[11].mxu0  ;;  %v3434_v19 = vpop.f32.mrb[9].mxu1 }
 0x3f0   : > { %v2023_v50 = vpop.f32.mrb[10].mxu1 }
 0x3f1   : > { %2036 = vst.msk [vmem:[%s5073_s3 + $0x8] sm:$0xff] %vm1141_vm3, %v2030_v43  ;;  %v2033_v52 = vsub.f32 %v2031_v53, %v1869_v47  ;;  %v2032_v54 = vsub.f32 %v2023_v50, %v1723_v5  ;;  %v3435_v55 = vpop.f32.mrb[11].mxu1 }
 0x3f3   : > { %2037 = vst.msk [vmem:[%s5079_s1] sm:$0xff] %vm1141_vm3, %v2033_v52  ;;  %v2034_v56 = vsub.f32 %v2032_v54, %v1872_v51 }
 0x3f5   : > { %2038 = vst.msk [vmem:[%s5079_s1 + $0x8] sm:$0xff] %vm1141_vm3, %v2034_v56 }
 0x40c   : > { %v2179_v57 = vpop.f32.mrb[12].mxu0 }
 0x40d   : > { %v3452_v58 = vpop.f32.mrb[13].mxu0 }
 0x40e   : > { %v2182_v59 = vpop.f32.mrb[14].mxu0  ;;  %v2310_v60 = vpop.f32.mrb[12].mxu1 }
 0x40f   : > { %v2452_v38 = vsub.f32 %v2179_v57, %v2310_v60  ;;  %v3453_v44 = vpop.f32.mrb[15].mxu0  ;;  %v3470_v63 = vpop.f32.mrb[13].mxu1 }
 0x410   : > { %v2313_v26 = vpop.f32.mrb[14].mxu1 }
 0x411   : > { %v2453_v1 = vsub.f32 %v2182_v59, %v2313_v26  ;;  %v3471_v2 = vpop.f32.mrb[15].mxu1 }
 0x413   : > { %v2458_v27 = vpack.c.bf16 %v2453_v1, %v2452_v38 }
 0x415   : > { %v2459_v3 = vunpack.c.l.bf16 %v2458_v27  ;;  %v2460_v4 = vunpack.c.h.bf16 %v2458_v27 }
 0x417   : > { %v2461_v7 = vsub.f32 %v2452_v38, %v2459_v3  ;;  %v2462_v12 = vsub.f32 %v2453_v1, %v2460_v4 }
 0x419   : > { %v2463_v13 = vpack.c.bf16 %v2462_v12, %v2461_v7 }
 0x41b   : > { %3493 = vmatmul.mubr.msk.bf16.vlgmr.msra.gmra.mrb[16].mxu1 %vm1141_vm3, %v2463_v13 }
 0x41c   : > { %3497 = vmatpush3.bf16.msra.mxu1 %v4951_v10  ;;  %3498 = vmatprep.mubr.msk.bf16.mxu1 %vm4310_vm0, %v4309_v0 }
 0x41d   : > { %3502 = vmatprep.subr.bf16.mxu1 %v4309_v0 }
 0x427   : > { %3499 = vmatmul.mubr.msk.bf16.vlgmr.msra.gmra.mrb[16].mxu1 %vm1141_vm3, %v2458_v27 }
 0x428   : > { %3503 = vmatpush3.bf16.msra.mxu1 %v4964_v36  ;;  %3504 = vmatprep.mubr.msk.bf16.mxu1 %vm4310_vm0, %v4309_v0 }
 0x429   : > { %3526 = vmatprep.subr.bf16.mxu1 %v4309_v0 }
 0x42c   : > { %v2443_v14 = vpop.f32.mrb[16].mxu0 }
 0x42d   : > { %v2454_v6 = vsub.f32 %v2443_v14, %v2179_v57  ;;  %v3488_v15 = vpop.f32.mrb[17].mxu0 }
 0x42e   : > { %v2446_v24 = vpop.f32.mrb[18].mxu0 }
 0x42f   : > { %v2456_v21 = vsub.f32 %v2454_v6, %v2310_v60  ;;  %v2455_v10 = vsub.f32 %v2446_v24, %v2182_v59  ;;  %v3489_v17 = vpop.f32.mrb[19].mxu0 }
 0x431   : > { %v2732_v41 = vadd.f32 %v2456_v21, %v2452_v38  ;;  %v2457_v25 = vsub.f32 %v2455_v10, %v2313_v26 }
 0x433   : > { %v2595_v22 = vpack.c.bf16 %v2457_v25, %v2456_v21  ;;  %v2733_v32 = vadd.f32 %v2457_v25, %v2453_v1  ;;  %3505 = vmatmul.mubr.msk.bf16.vlgmr.msra.gmra.mrb[16].mxu1 %vm1141_vm3, %v2458_v27 }
 0x434   : > { %3527 = vmatpush3.bf16.msra.mxu1 %v4971_v45  ;;  %3528 = vmatprep.mubr.msk.bf16.mxu1 %vm4310_vm0, %v4309_v0 }
 0x435   : > { %v2596_v36 = vunpack.c.l.bf16 %v2595_v22  ;;  %v2597_v23 = vunpack.c.h.bf16 %v2595_v22  ;;  %v2734_v28 = vpack.c.bf16 %v2733_v32, %v2732_v41  ;;  %3532 = vmatprep.subr.bf16.mxu1 %v4309_v0 }
 0x437   : > { %v2598_v29 = vsub.f32 %v2456_v21, %v2596_v36  ;;  %v2599_v33 = vsub.f32 %v2457_v25, %v2597_v23  ;;  %v2735_v34 = vunpack.c.l.bf16 %v2734_v28  ;;  %v2736_v35 = vunpack.c.h.bf16 %v2734_v28 }
 0x439   : > { %v2600_v37 = vpack.c.bf16 %v2599_v33, %v2598_v29  ;;  %v2737_v39 = vsub.f32 %v2732_v41, %v2735_v34  ;;  %v2738_v40 = vsub.f32 %v2733_v32, %v2736_v35 }
 0x43b   : > { %v2739_v42 = vpack.c.bf16 %v2738_v40, %v2737_v39  ;;  %3511 = vmatmul.mubr.msk.bf16.vlgmr.msra.gmra.mrb[20].mxu0 %vm1141_vm3, %v2600_v37 }
 0x43c   : > { %3515 = vmatpush3.bf16.msra.mxu0 %v4955_v11  ;;  %3516 = vmatprep.mubr.msk.bf16.mxu0 %vm4310_vm0, %v4309_v0 }
 0x43d   : > { %3529 = vmatmul.mubr.msk.bf16.vlgmr.msra.gmra.mrb[20].mxu1 %vm1141_vm3, %v2739_v42  ;;  %3520 = vmatprep.subr.bf16.mxu0 %v4309_v0 }
 0x43e   : > { %3533 = vmatpush3.bf16.msra.mxu1 %v4971_v45  ;;  %3534 = vmatprep.mubr.msk.bf16.mxu1 %vm4310_vm0, %v4309_v0 }
 0x43f   : > { %3538 = vmatprep.subr.bf16.mxu1 %v4309_v0 }
 0x447   : > { %3517 = vmatmul.mubr.msk.bf16.vlgmr.msra.gmra.mrb[20].mxu0 %vm1141_vm3, %v2595_v22 }
 0x448   : > { %3521 = vmatpush3.bf16.msra.mxu0 %v5000_v16  ;;  %3522 = vmatprep.mubr.msk.bf16.mxu0 %vm4310_vm0, %v4309_v0 }
 0x449   : > { %3535 = vmatmul.mubr.msk.bf16.vlgmr.msra.gmra.mrb[20].mxu1 %vm1141_vm3, %v2734_v28 }
 0x44a   : > { %3539 = vmatpush3.bf16.msra.mxu1 %v5002_v18  ;;  %3540 = vmatprep.mubr.msk.bf16.mxu1 %vm4310_vm0, %v4309_v0 }
 0x453   : > { %3523 = vmatmul.mubr.msk.bf16.vlgmr.msra.gmra.mrb[20].mxu0 %vm1141_vm3, %v2595_v22 }
 0x455   : > { %3541 = vmatmul.mubr.msk.bf16.vlgmr.msra.gmra.mrb[20].mxu1 %vm1141_vm3, %v2734_v28 }
 0x506   : > { %v2586_v11 = vpop.f32.mrb[16].mxu1 }
 0x507   : > { %v3506_v45 = vpop.f32.mrb[17].mxu1 }
 0x508   : > { %v2589_v30 = vpop.f32.mrb[18].mxu1 }
 0x509   : > { %v3507_v31 = vpop.f32.mrb[19].mxu1 }
 0x526   : > { %v2723_v0 = vpop.f32.mrb[20].mxu0 }
 0x527   : > { %v2871_v16 = vsub.f32 %v2586_v11, %v2723_v0  ;;  %v3524_v18 = vpop.f32.mrb[21].mxu0 }
 0x528   : > { %v2726_v61 = vpop.f32.mrb[22].mxu0  ;;  %v2862_v62 = vpop.f32.mrb[20].mxu1 }
 0x529   : > { %3234 = vst.msk [vmem:[%s5073_s3 + $0x10] sm:$0xff] %vm1141_vm3, %v2871_v16  ;;  %v2872_v20 = vsub.f32 %v2589_v30, %v2726_v61  ;;  %v2873_v5 = vsub.f32 %v2862_v62, %v2586_v11  ;;  %v3525_v8 = vpop.f32.mrb[23].mxu0  ;;  %v3542_v47 = vpop.f32.mrb[21].mxu1 }
 0x52a   : > { %v2865_v49 = vpop.f32.mrb[22].mxu1 }
 0x52b   : > { %3235 = vst.msk [vmem:[%s5073_s3 + $0x18] sm:$0xff] %vm1141_vm3, %v2872_v20  ;;  %v2875_v46 = vsub.f32 %v2873_v5, %v2723_v0  ;;  %v2874_v51 = vsub.f32 %v2865_v49, %v2589_v30  ;;  %v3543_v9 = vpop.f32.mrb[23].mxu1 }
 0x52c   : > { %4129 = shalt.err (!%p4126_p0)
}
 0x52d   : > { %s4130_s17 = scalar_lea.hbm %s5133_s20, 512  ;;  %s4134_s24 = scalar_lea.hbm %s5360_s2, 8192 }
 0x52e   : > { %p4131_p9 = scmp.ne.s32.totalorder %s5133_s20, %s4130_s17  ;;  %p4135_p4 = scmp.lt.u32.totalorder %s5133_s20, %s5360_s2 }
 0x52f   : > { %p4136_p13 = scmp.lt.u32.totalorder %s4134_s24, %s4130_s17  ;;  %p4138_p3 = scmp.lt.u32.totalorder %s4130_s17, %s5133_s20 }
 0x530   : > { %p4132_p7 = pnand %p4131_p9, %p5362_p11 }
 0x531   : > { %p4137_p1 = por %p4136_p13, %p4135_p4 }
 0x532   : > { %p4133_p10 = pneg %p4132_p7 }
 0x533   : > { %p4139_p5 = por %p4138_p3, %p4137_p1 }
 0x535   : > { %p4140_p8 = pnand %p4139_p5, %p4133_p10 }
 0x537   : > { %4143 = shalt.err (!%p4140_p8)
}
 0x538   : > { %s4318_s25 = smov 128   ;;  %s4319_s9 = smov 8   ;;  %3236 = vst.msk [vmem:[%s5079_s1 + $0x10] sm:$0xff] %vm1141_vm3, %v2875_v46  ;;  %v2876_v43 = vsub.f32 %v2874_v51, %v2726_v61 }
 0x539   : > { %3680 = dma.vmem_to_hbm [thread:$0]  (%p5362_p11), %s5126_s12, 512, %s5133_s20, %s2884_s10, %s4318_s25, %s4318_s25, %s4319_s9  }
 0x53a   : > { %s5363_s16 = sld [smem:[#allocation53_spill]]  ;;  %3237 = vst.msk [vmem:[%s5079_s1 + $0x18] sm:$0xff] %vm1141_vm3, %v2876_v43  ;;  %s2889_s27 = scalar_lea.sflag [#allocation18], %s5070_s0 }
 0x53b   : > { %s4144_s30 = scalar_lea.vmem %s5178_s29, 512  ;;  %s4320_s5 = smov [#allocation17]  }
 0x53c   : > { %p4145_p2 = scmp.ne.s32.totalorder %s5178_s29, %s4144_s30  ;;  %s4148_s12 = sshll.u32 %s4320_s5, 4  ;;  %s4149_s12 = int_to_ptr.vmem [resolvable:$false] %s4148_s12 }
 0x53d   : > { %s4150_s20 = scalar_lea.vmem %s4149_s12, 1024  ;;  %p4151_p0 = scmp.lt.s32.totalorder %s5178_s29, %s4149_s12 }
 0x53e   : > { %p4146_p12 = pnand %p4145_p2, %p5362_p11  ;;  %p4152_p9 = scmp.lt.s32.totalorder %s4150_s20, %s4144_s30 }
 0x540   : > { %s5174_s19 = scalar_lea.hbm %s5363_s16, %s3243_s4  ;;  %p4147_p6 = pneg %p4146_p12 }
 0x541   : > { %p4153_p7 = por %p4152_p9, %p4151_p0 }
 0x543   : > { %p4154_p10 = pnand %p4153_p7, %p4147_p6 }
 0x545   : > { %4157 = shalt.err (!%p4154_p10)
}
 0x546   : > { %s4158_s1 = scalar_lea.hbm %s5174_s19, 512  ;;  %s4162_s17 = scalar_lea.hbm %s5363_s16, 8192 }
 0x547   : > { %p4159_p4 = scmp.ne.s32.totalorder %s5174_s19, %s4158_s1  ;;  %p4163_p3 = scmp.lt.u32.totalorder %s5174_s19, %s5363_s16 }
 0x548   : > { %p4164_p5 = scmp.lt.u32.totalorder %s4162_s17, %s4158_s1  ;;  %p4166_p2 = scmp.lt.u32.totalorder %s4158_s1, %s5174_s19 }
 0x549   : > { %p4160_p13 = pnand %p4159_p4, %p5362_p11 }
 0x54a   : > { %p4165_p8 = por %p4164_p5, %p4163_p3 }
 0x54b   : > { %p4161_p1 = pneg %p4160_p13 }
 0x54c   : > { %p4167_p12 = por %p4166_p2, %p4165_p8 }
 0x54e   : > { %p4168_p6 = pnand %p4167_p12, %p4161_p1 }
 0x550   : > { %4171 = shalt.err (!%p4168_p6)
}
 0x551   : > { %3681 = dma.vmem_to_hbm [thread:$0]  (%p5362_p11), %s5178_s29, 512, %s5174_s19, %s2889_s27, %s4318_s25, %s4318_s25, %s4319_s9  }
 0x552 PF: > { %s5364_s24 = sld [smem:[#allocation34_spill]]  ;;  %s5365_s3 = sld [smem:[#allocation28_spill]] }
 0x553   : > { %s5366_s8 = sld [smem:[#allocation41_spill]] }
 0x558   : > { %p3735_p0 = scmp.ge.s32.totalorder %s5364_s24, 2  ;;  %s2939_s22 = sand.u32 1, %s5365_s3  }
 0x559   : > { %p5367_p9 = scmp.ne.s32.totalorder %s5366_s8, 0  ;;  %s2940_s7 = scalar_lea.sflag [#allocation4], %s2939_s22 }
 0x55b   : > { %p3714_p7 = pnand %p3735_p0, %p5367_p9 }
 0x55d   : > { %4245 = dma.done.wait (!%p3714_p7), %s2940_s7, 512  }
 0x55e   : > { %4247 = vsyncadd (!%p3714_p7), %s2940_s7, 4294966784  ;;  %s2949_s23 = scalar_lea.sflag [#allocation18], %s2939_s22 }
 0x55f   : > { %4249 = dma.done.wait (!%p3714_p7), %s2949_s23, 512  }
 0x560   : > { %4251 = vsyncadd (!%p3714_p7), %s2949_s23, 4294966784  ;;  %s32_s27 = sadd.s32 1, %s5364_s24   ;;  %s5368_s0 = sld [smem:[#allocation29_spill]] }
 0x561   : > { %p29_p10 = scmp.ge.s32.totalorder %s32_s27, 18   ;;  %s5369_s19 = sld [smem:[#allocation40_spill]] }
 0x562   : > { %s5370_s29 = sld [smem:[#allocation30_spill]]  ;;  %s5371_s22 = sld [smem:[#allocation39_spill]] }
 0x563   : > { %s5372_s23 = sld [smem:[#allocation33_spill]]  ;;  %s5373_s25 = sld [smem:[#allocation36_spill]] }
 0x564   : > { %s5374_s9 = sld [smem:[#allocation37_spill]]  ;;  %s5375_s17 = smov %s4258_s18 }
 0x565   : > { %s5377_s20 = smov %s4270_s21  ;;  %s5379_s24 = smov %s4290_s26 }
 0x566   : > { %s5376_s18 = smov %s5368_s0  ;;  %31 = sbr.rel (!%p29_p10) target bundleno = 26 (0x1a), region = 177 }
 0x568   : > { %s5378_s21 = smov %s5370_s29 }
 0x56a   : > { %s5380_s26 = smov %s5374_s9 }
 0x56d   :  { %2954 = vsyncpa [#allocation3], 1 }
 0x56e   :  { %2956 = vsyncpa [#allocation3 + $0x1], 1 }
 0x56f   :  { %2957 = vsyncpa [#allocation8], 1 }
 0x570   :  { %2958 = vsyncpa [#allocation11], 1 }
 0x571   :  { %2959 = vsyncpa [#allocation4], 1 }
 0x572   :  { %2961 = vsyncpa [#allocation4 + $0x1], 1 }
 0x573   :  { %2962 = vsyncpa [#allocation18], 1 }
 0x574   :  { %2964 = vsyncpa [#allocation18 + $0x1], 1 }
 0x575   :  { %2965 = vsyncpa [#allocation5], 1 }
 0x576   :  { %2967 = vsyncpa [#allocation5 + $0x1], 1 }

</bundles_post_ra>
